<compile_context>
chip_gen: v7x
topology: tpu7x:2x2x1
jax: 0.10.0
libtpu: 0.0.40
codegen_flags: <defaults>
</compile_context>

<pallas_src>
import functools

import jax
import jax.numpy as jnp
from jax.experimental import pallas as pl
from jax.experimental.pallas import tpu as pltpu


# ----------------------------- config ---------------------------------------
class Config:
    # (n_in, n_out) for each hidden layer, mirroring `config.layer_info`
    layer_info = [(32, 32), (32, 32)]
    init_w = 3e-3


STATE_DIM = 16
ACTION_DIM = 8
MAX_ACTION = 2.0
BATCH = 1024          # 2 tiles of 512 -> both TensorCores on v7x, tiny overhead elsewhere


def _round_up(x, m):
    return (x + m - 1) // m * m


# ----------------------------- kernel ---------------------------------------
def actor_mlp_kernel(x_ref, p_ref, out_ref, *, layer_meta, max_action):
    """Fused MLP in natural (batch, features) layout, all f32.

    x_ref:      (tile_b, state_dim) f32 block of the state.
    p_ref:      (slab_rows, slab_cols) f32 parameter slab, resident in VMEM
                (single DMA, constant index_map). Per layer it holds W^T rows
                followed by an 8-row-aligned bias row.
    out_ref:    (tile_b, action_dim) f32 block of the output.
    layer_meta: static tuple of (w_row, b_row, n_in, n_out) per linear layer.
    """
    a = x_ref[...]                                     # (tile_b, state_dim) f32
    n_layers = len(layer_meta)
    for li, (w_row, b_row, n_in, n_out) in enumerate(layer_meta):
        w_t = p_ref[w_row:w_row + n_in, 0:n_out]       # (n_in, n_out) = W_i^T (static slice)
        b = p_ref[b_row:b_row + 1, 0:n_out]            # (1, n_out)
        z = jnp.dot(a, w_t, preferred_element_type=jnp.float32) + b   # MXU, f32 acc
        if li < n_layers - 1:
            a = jnp.maximum(z, 0.0)                    # ReLU (VPU)
        else:
            a = max_action * jnp.tanh(z)               # tanh (EUP) + scale
    out_ref[...] = a.astype(out_ref.dtype)             # (tile_b, action_dim)


# ----------------------------- param packing ---------------------------------
def pack_params(weights, biases):
    """Coalesce all layers into one f32 slab (single prologue DMA).

    Per-layer section (8-row aligned):
      rows [w_row, w_row + n_in)  : W_i^T  (cols 0:n_out, rest zero)
      row  b_row                  : bias_i (cols 0:n_out; 7 padding rows follow)
    Returns (slab, meta) with meta = tuple of (w_row, b_row, n_in, n_out).
    """
    col_max = max(int(w.shape[0]) for w in weights)    # max n_out
    blocks, meta = [], []
    row = 0
    for w, b in zip(weights, biases):
        n_out, n_in = int(w.shape[0]), int(w.shape[1])
        n_in_pad = _round_up(n_in, 8)
        wt = jnp.zeros((n_in_pad, col_max), jnp.float32)
        wt = wt.at[:n_in, :n_out].set(w.T.astype(jnp.float32))
        brow = jnp.zeros((8, col_max), jnp.float32)
        brow = brow.at[0, :n_out].set(b.astype(jnp.float32).reshape(-1))
        blocks.extend([wt, brow])
        meta.append((row, row + n_in_pad, n_in, n_out))
        row += n_in_pad + 8
    slab = jnp.concatenate(blocks, axis=0)
    return slab, tuple(meta)


# ----------------------------- wrapper ---------------------------------------
def actor_forward(state, param_slab, layer_meta, *, max_action):
    """state: (B, state_dim) f32 -> (B, action_dim) f32. Single pallas_call."""
    B, state_dim = state.shape
    action_dim = layer_meta[-1][3]

    # One big batch tile per TensorCore: 2 grid steps (v7x gets both TCs via
    # the "parallel" axis; on v5e/v6e the second step costs ~0.35 us).
    if B % 16 == 0:
        num_tiles = 2
    else:
        num_tiles = 1
    tile_b = B // num_tiles

    kernel = functools.partial(
        actor_mlp_kernel, layer_meta=layer_meta, max_action=max_action
    )

    return pl.pallas_call(
        kernel,
        out_shape=jax.ShapeDtypeStruct((B, action_dim), jnp.float32),
        grid_spec=pltpu.PrefetchScalarGridSpec(
            num_scalar_prefetch=0,
            grid=(num_tiles,),
            in_specs=[
                # Streaming state: one (tile_b, state_dim) block per grid step.
                pl.BlockSpec((tile_b, state_dim), lambda i: (i, 0)),
                # All parameters: one slab, constant index_map -> resident in VMEM.
                pl.BlockSpec(param_slab.shape, lambda i: (0, 0)),
            ],
            out_specs=pl.BlockSpec((tile_b, action_dim), lambda i: (i, 0)),
        ),
        compiler_params=pltpu.CompilerParams(
            dimension_semantics=("parallel",),   # shards batch tiles across TCs on v7x
        ),
    )(state, param_slab)


# ----------------------------- param init ------------------------------------
def init_actor_params(key, state_dim, action_dim, config):
    """Mirror nn.Linear defaults; output_layer uses uniform(+/-init_w).

    Weights kept in PyTorch (out_features, in_features) layout; biases 1-D.
    """
    layer_dims = [(state_dim, config.layer_info[0][0])]
    layer_dims += [(n_in, n_out) for n_in, n_out in config.layer_info]
    layer_dims.append((config.layer_info[-1][1], action_dim))

    weights, biases = [], []
    keys = jax.random.split(key, 2 * len(layer_dims))
    for li, (n_in, n_out) in enumerate(layer_dims):
        kw, kb = keys[2 * li], keys[2 * li + 1]
        bound = config.init_w if li == len(layer_dims) - 1 else float(n_in) ** -0.5
        weights.append(jax.random.uniform(kw, (n_out, n_in), jnp.float32, -bound, bound))
        biases.append(jax.random.uniform(kb, (n_out,), jnp.float32, -bound, bound))
    return weights, biases


def actor_forward_ref(state, weights, biases, *, max_action):
    """Pure-JAX f32 reference with identical semantics to the PyTorch module."""
    a = state
    for i, (w, b) in enumerate(zip(weights, biases)):
        a = a @ w.T + b.reshape(1, -1)
        if i < len(weights) - 1:
            a = jnp.maximum(a, 0.0)
        else:
            a = max_action * jnp.tanh(a)
    return a


# ----------------------------- main -------------------------------------------
if __name__ == "__main__":
    key = jax.random.PRNGKey(0)
    k_params, k_state = jax.random.split(key)

    cfg = Config()
    weights, biases = init_actor_params(k_params, STATE_DIM, ACTION_DIM, cfg)
    param_slab, layer_meta = pack_params(weights, biases)
    state = jax.random.normal(k_state, (BATCH, STATE_DIM), jnp.float32)

    out = actor_forward(state, param_slab, layer_meta, max_action=MAX_ACTION)
    out = jax.block_until_ready(out)

    ref = actor_forward_ref(state, weights, biases, max_action=MAX_ACTION)
    assert out.shape == (BATCH, ACTION_DIM)
    # Both paths are f32; tolerance only covers possible default-precision
    # (bf16-pass) MXU matmuls on either side — actual parity is much tighter.
    assert jnp.allclose(out, ref, atol=2e-2, rtol=2e-2), "mismatch vs JAX reference"

    print("KERNEL_OK")
</pallas_src>

<mosaic_0001>
module attributes {stable_mosaic.version = 11 : i64} {
  func.func @actor_mlp_kernel(%arg0: i32, %arg1: memref<512x16xf32, #tpu.memory_space<vmem>>, %arg2: memref<144x32xf32, #tpu.memory_space<vmem>>, %arg3: memref<512x8xf32, #tpu.memory_space<vmem>>) attributes {dimension_semantics = [#tpu.dimension_semantics<parallel>], iteration_bounds = array<i64: 2>, scalar_prefetch = 0 : i64, scratch_operands = 0 : i64, tpu.core_type = #tpu.core_type<tc>, window_params = [{transform_indices = @transform_0, window_bounds = array<i64: 512, 16>}, {pipeline_mode = #tpu.pipeline_mode<synchronous>, transform_indices = @transform_1, window_bounds = array<i64: 144, 32>}, {transform_indices = @transform_2, window_bounds = array<i64: 512, 8>}]} {
    %c0 = arith.constant 0 : index
    %c0_0 = arith.constant 0 : index
    %0 = vector.load %arg1[%c0, %c0_0] : memref<512x16xf32, #tpu.memory_space<vmem>>, vector<512x16xf32>
    %c0_1 = arith.constant 0 : index
    %c0_2 = arith.constant 0 : index
    %1 = vector.load %arg2[%c0_1, %c0_2] : memref<144x32xf32, #tpu.memory_space<vmem>>, vector<16x32xf32>
    %c16 = arith.constant 16 : index
    %c0_3 = arith.constant 0 : index
    %2 = vector.load %arg2[%c16, %c0_3] : memref<144x32xf32, #tpu.memory_space<vmem>>, vector<1x32xf32>
    %cst = arith.constant dense<0.000000e+00> : vector<512x32xf32>
    %3 = tpu.matmul %0, %1, %cst {dimension_numbers = #tpu.dot_dimension_numbers<[1], [0], [0], [1], [0, 0, 1, 1], [], []>} : vector<512x16xf32>, vector<16x32xf32>, vector<512x32xf32> -> vector<512x32xf32>
    %4 = vector.broadcast %2 : vector<1x32xf32> to vector<512x32xf32>
    %5 = arith.addf %3, %4 : vector<512x32xf32>
    %cst_4 = arith.constant 0.000000e+00 : f32
    %6 = vector.broadcast %cst_4 : f32 to vector<512x32xf32>
    %7 = arith.maximumf %5, %6 : vector<512x32xf32>
    %c24 = arith.constant 24 : index
    %c0_5 = arith.constant 0 : index
    %8 = vector.load %arg2[%c24, %c0_5] : memref<144x32xf32, #tpu.memory_space<vmem>>, vector<32x32xf32>
    %c56 = arith.constant 56 : index
    %c0_6 = arith.constant 0 : index
    %9 = vector.load %arg2[%c56, %c0_6] : memref<144x32xf32, #tpu.memory_space<vmem>>, vector<1x32xf32>
    %cst_7 = arith.constant dense<0.000000e+00> : vector<512x32xf32>
    %10 = tpu.matmul %7, %8, %cst_7 {dimension_numbers = #tpu.dot_dimension_numbers<[1], [0], [0], [1], [0, 0, 1, 1], [], []>} : vector<512x32xf32>, vector<32x32xf32>, vector<512x32xf32> -> vector<512x32xf32>
    %11 = vector.broadcast %9 : vector<1x32xf32> to vector<512x32xf32>
    %12 = arith.addf %10, %11 : vector<512x32xf32>
    %cst_8 = arith.constant 0.000000e+00 : f32
    %13 = vector.broadcast %cst_8 : f32 to vector<512x32xf32>
    %14 = arith.maximumf %12, %13 : vector<512x32xf32>
    %c64 = arith.constant 64 : index
    %c0_9 = arith.constant 0 : index
    %15 = vector.load %arg2[%c64, %c0_9] : memref<144x32xf32, #tpu.memory_space<vmem>>, vector<32x32xf32>
    %c96 = arith.constant 96 : index
    %c0_10 = arith.constant 0 : index
    %16 = vector.load %arg2[%c96, %c0_10] : memref<144x32xf32, #tpu.memory_space<vmem>>, vector<1x32xf32>
    %cst_11 = arith.constant dense<0.000000e+00> : vector<512x32xf32>
    %17 = tpu.matmul %14, %15, %cst_11 {dimension_numbers = #tpu.dot_dimension_numbers<[1], [0], [0], [1], [0, 0, 1, 1], [], []>} : vector<512x32xf32>, vector<32x32xf32>, vector<512x32xf32> -> vector<512x32xf32>
    %18 = vector.broadcast %16 : vector<1x32xf32> to vector<512x32xf32>
    %19 = arith.addf %17, %18 : vector<512x32xf32>
    %cst_12 = arith.constant 0.000000e+00 : f32
    %20 = vector.broadcast %cst_12 : f32 to vector<512x32xf32>
    %21 = arith.maximumf %19, %20 : vector<512x32xf32>
    %c104 = arith.constant 104 : index
    %c0_13 = arith.constant 0 : index
    %22 = vector.load %arg2[%c104, %c0_13] : memref<144x32xf32, #tpu.memory_space<vmem>>, vector<32x8xf32>
    %c136 = arith.constant 136 : index
    %c0_14 = arith.constant 0 : index
    %23 = vector.load %arg2[%c136, %c0_14] : memref<144x32xf32, #tpu.memory_space<vmem>>, vector<1x8xf32>
    %cst_15 = arith.constant dense<0.000000e+00> : vector<512x8xf32>
    %24 = tpu.matmul %21, %22, %cst_15 {dimension_numbers = #tpu.dot_dimension_numbers<[1], [0], [0], [1], [0, 0, 1, 1], [], []>} : vector<512x32xf32>, vector<32x8xf32>, vector<512x8xf32> -> vector<512x8xf32>
    %25 = vector.broadcast %23 : vector<1x8xf32> to vector<512x8xf32>
    %26 = arith.addf %24, %25 : vector<512x8xf32>
    %27 = math.tanh %26 : vector<512x8xf32>
    %cst_16 = arith.constant 2.000000e+00 : f32
    %28 = vector.broadcast %cst_16 : f32 to vector<512x8xf32>
    %29 = arith.mulf %28, %27 : vector<512x8xf32>
    %c0_17 = arith.constant 0 : index
    %c0_18 = arith.constant 0 : index
    %30 = vector.load %arg3[%c0_17, %c0_18] : memref<512x8xf32, #tpu.memory_space<vmem>>, vector<512x8xf32>
    tpu.vector_store %arg3[%c0_17, %c0_18], %29 {strides = array<i32>} : memref<512x8xf32, #tpu.memory_space<vmem>>, vector<512x8xf32>,
    return
  }
  func.func @transform_0(%arg0: i32) -> (i32, i32) {
    %c0_i32 = arith.constant 0 : i32
    %c0_i32_0 = arith.constant 0 : i32
    return %arg0, %c0_i32 : i32, i32
  }
  func.func @transform_1(%arg0: i32) -> (i32, i32) {
    %c0_i32 = arith.constant 0 : i32
    %c0_i32_0 = arith.constant 0 : i32
    %c0_i32_1 = arith.constant 0 : i32
    return %c0_i32, %c0_i32_0 : i32, i32
  }
  func.func @transform_2(%arg0: i32) -> (i32, i32) {
    %c0_i32 = arith.constant 0 : i32
    %c0_i32_0 = arith.constant 0 : i32
    return %arg0, %c0_i32 : i32, i32
  }
}

</mosaic_0001>

<bundles_post_ra>
// kernel: tpu_custom_call.1
= control target key start
LH: loop header
LB: loop body
LE: loop exit
PB: predicated region body
PF: predicated region fallthrough
CT: control target
= control target key end

     0   :  { %s4136_s9 = smov 0   ;;  %s4930_s0 = inlined_call_operand.vmem [shape: f32[1024,16], index: 0, kind: input, shape index: {}]   ;;  %s4931_s1 = inlined_call_operand.vmem [shape: f32[144,32], index: 1, kind: input, shape index: {}]   ;;  %s4932_s2 = inlined_call_operand.vmem [shape: f32[1024,8], index: 2, kind: output, shape index: {}]  }
   0x1 LB: > { %s2996_s10 = sadd.s32 4294967295, %s4119_s9   ;;  %p3000_p0 = scmp.ge.s32.totalorder %s4119_s9, 1  ;;  %s4119_s9 = sphi %s4136_s9, %s12_s9  }
   0x2   : > { %p113_p1 = scmp.lt.s32.totalorder %s4119_s9, 3 }
   0x4   : > { %p114_p2 = pnand %p3000_p0, %p113_p1 }
   0x5   : > { %v211_v0 = vld [vmem:[%s4931_s1] sm:$0xff] (!%p114_p2)  ;;  %v212_v1 = vld [vmem:[%s4931_s1 + $0x8] sm:$0xff] (!%p114_p2)  ;;  %s3001_s15 = sshll.u32 (!%p114_p2), %s2996_s10, 6  ;;  %vm218_vm0 = vcmask (!%p114_p2), 130048   ;;  %v860_v3 = vld [vmem:[%s4931_s1 + $0x18] sm:$0xff] (!%p114_p2)  ;;  %vm869_vm1 = vcmask (!%p114_p2), 261120  }
   0x6   : > { %117 = sbr.rel (%p114_p2) target bundleno = 1025 (0x401), region = 28  ;;  %v3949_v2 = vpack.c.bf16 (!%p114_p2), %v212_v1, %v211_v0  ;;  %p136_p3 = scmp.lt.s32.totalorder (!%p114_p2), %s3001_s15, 127  ;;  %v861_v4 = vld [vmem:[%s4931_s1 + $0x20] sm:$0xff] (!%p114_p2)  ;;  %v862_v51 = vld [vmem:[%s4931_s1 + $0x28] sm:$0xff] (!%p114_p2)  ;;  %v863_v52 = vld [vmem:[%s4931_s1 + $0x30] sm:$0xff] (!%p114_p2)  ;;  %vm2875_vm2 = vcmask (!%p114_p2), 64512  }
   0x7   : > { %v3953_v5 = vpack.c.bf16 (!%p114_p2), %v861_v4, %v860_v3  ;;  %v3957_v53 = vpack.c.bf16 (!%p114_p2), %v863_v52, %v862_v51 }
   0x8   : > { %3950 = vmatprep.subr.bf16.mxu0 (!%p114_p2), %v3949_v2 }
   0x9   : > { %3952 = vmatpush3.bf16.msra.mxu0 (!%p114_p2), %v3949_v2  ;;  %3954 = vmatprep.subr.bf16.mxu1 (!%p114_p2), %v3953_v5 }
   0xa   : > { %3956 = vmatpush3.bf16.msra.mxu1 (!%p114_p2), %v3953_v5 }
   0xb   : > { %3958 = vmatprep.subr.bf16.mxu1 (!%p114_p2), %v3957_v53 }
   0xd   : > { %s4934_s15 = smov (!%p136_p3, %s3001_s15), 127 }
   0xe   : > { %s3002_s16 = sshll.u32 %s4934_s15, 3  ;;  %3960 = vmatpush3.bf16.msra.mxu1 %v3957_v53 }
   0xf   : > { %s4164_s23 = scalar_lea.vmem %s4930_s0, %s3002_s16  ;;  %s4739_s29 = scalar_lea.vmem %s4932_s2, %s3002_s16 }
  0x10   : > { %v147_v6 = vld [vmem:[%s4164_s23] sm:$0xff]  ;;  %v148_v7 = vld [vmem:[%s4164_s23 + $0x8] sm:$0xff]  ;;  %v149_v8 = vld [vmem:[%s4164_s23 + $0x10] sm:$0xff] }
  0x11   : > { %3541 = vmatprep.mubr.msk.f32.mxu0 %vm218_vm0, %v147_v6  ;;  %v150_v9 = vld [vmem:[%s4164_s23 + $0x18] sm:$0xff]  ;;  %v151_v10 = vld [vmem:[%s4164_s23 + $0x20] sm:$0xff]  ;;  %v152_v11 = vld [vmem:[%s4164_s23 + $0x28] sm:$0xff] }
  0x12   : > { %3542 = vmatmul.mubr.msk.f32.vlgmr.msra.gmra.mrb[0].mxu0 %vm218_vm0, %v148_v7  ;;  %v153_v12 = vld [vmem:[%s4164_s23 + $0x30] sm:$0xff]  ;;  %v154_v13 = vld [vmem:[%s4164_s23 + $0x38] sm:$0xff]  ;;  %v155_v14 = vld [vmem:[%s4164_s23 + $0x40] sm:$0xff] }
  0x13   : > { %3544 = vmatprep.mubr.msk.f32.mxu0 %vm218_vm0, %v149_v8  ;;  %v156_v15 = vld [vmem:[%s4164_s23 + $0x48] sm:$0xff]  ;;  %v157_v16 = vld [vmem:[%s4164_s23 + $0x50] sm:$0xff]  ;;  %v158_v17 = vld [vmem:[%s4164_s23 + $0x58] sm:$0xff] }
  0x14   : > { %v159_v18 = vld [vmem:[%s4164_s23 + $0x60] sm:$0xff]  ;;  %v160_v19 = vld [vmem:[%s4164_s23 + $0x68] sm:$0xff]  ;;  %v161_v20 = vld [vmem:[%s4164_s23 + $0x70] sm:$0xff] }
  0x15   : > { %v162_v21 = vld [vmem:[%s4164_s23 + $0x78] sm:$0xff]  ;;  %v163_v22 = vld [vmem:[%s4164_s23 + $0x80] sm:$0xff]  ;;  %v164_v23 = vld [vmem:[%s4164_s23 + $0x88] sm:$0xff] }
  0x16   : > { %3545 = vmatmul.mubr.msk.f32.gmra.mrb[2].mxu0 %vm218_vm0, %v150_v9  ;;  %v165_v24 = vld [vmem:[%s4164_s23 + $0x90] sm:$0xff]  ;;  %v166_v25 = vld [vmem:[%s4164_s23 + $0x98] sm:$0xff]  ;;  %v167_v26 = vld [vmem:[%s4164_s23 + $0xa0] sm:$0xff] }
  0x17   : > { %3547 = vmatprep.mubr.msk.f32.mxu0 %vm218_vm0, %v151_v10  ;;  %v168_v27 = vld [vmem:[%s4164_s23 + $0xa8] sm:$0xff]  ;;  %v169_v28 = vld [vmem:[%s4164_s23 + $0xb0] sm:$0xff]  ;;  %v170_v29 = vld [vmem:[%s4164_s23 + $0xb8] sm:$0xff] }
  0x18   : > { %v171_v30 = vld [vmem:[%s4164_s23 + $0xc0] sm:$0xff]  ;;  %v172_v31 = vld [vmem:[%s4164_s23 + $0xc8] sm:$0xff]  ;;  %v173_v32 = vld [vmem:[%s4164_s23 + $0xd0] sm:$0xff] }
  0x19   : > { %v174_v33 = vld [vmem:[%s4164_s23 + $0xd8] sm:$0xff]  ;;  %v175_v34 = vld [vmem:[%s4164_s23 + $0xe0] sm:$0xff]  ;;  %v176_v35 = vld [vmem:[%s4164_s23 + $0xe8] sm:$0xff] }
  0x1a   : > { %3548 = vmatmul.mubr.msk.f32.gmra.mrb[4].mxu0 %vm218_vm0, %v152_v11  ;;  %v177_v36 = vld [vmem:[%s4164_s23 + $0xf0] sm:$0xff]  ;;  %v178_v37 = vld [vmem:[%s4164_s23 + $0xf8] sm:$0xff]  ;;  %v179_v38 = vld [vmem:[%s4164_s23 + $0x100] sm:$0xff] }
  0x1b   : > { %3550 = vmatprep.mubr.msk.f32.mxu0 %vm218_vm0, %v153_v12  ;;  %v180_v39 = vld [vmem:[%s4164_s23 + $0x108] sm:$0xff]  ;;  %v181_v40 = vld [vmem:[%s4164_s23 + $0x110] sm:$0xff]  ;;  %v182_v41 = vld [vmem:[%s4164_s23 + $0x118] sm:$0xff] }
  0x1c   : > { %v183_v42 = vld [vmem:[%s4164_s23 + $0x120] sm:$0xff]  ;;  %v184_v43 = vld [vmem:[%s4164_s23 + $0x128] sm:$0xff]  ;;  %v185_v44 = vld [vmem:[%s4164_s23 + $0x130] sm:$0xff] }
  0x1d   : > { %v186_v45 = vld [vmem:[%s4164_s23 + $0x138] sm:$0xff]  ;;  %v187_v46 = vld [vmem:[%s4164_s23 + $0x140] sm:$0xff]  ;;  %v188_v47 = vld [vmem:[%s4164_s23 + $0x148] sm:$0xff] }
  0x1e   : > { %3551 = vmatmul.mubr.msk.f32.gmra.mrb[6].mxu0 %vm218_vm0, %v154_v13  ;;  %v189_v48 = vld [vmem:[%s4164_s23 + $0x150] sm:$0xff]  ;;  %v190_v49 = vld [vmem:[%s4164_s23 + $0x158] sm:$0xff]  ;;  %v191_v50 = vld [vmem:[%s4164_s23 + $0x160] sm:$0xff] }
  0x1f   : > { %3553 = vmatprep.mubr.msk.f32.mxu0 %vm218_vm0, %v155_v14  ;;  %v192_v54 = vld [vmem:[%s4164_s23 + $0x168] sm:$0xff]  ;;  %v193_v55 = vld [vmem:[%s4164_s23 + $0x170] sm:$0xff]  ;;  %v194_v56 = vld [vmem:[%s4164_s23 + $0x178] sm:$0xff] }
  0x20   : > { %v195_v57 = vld [vmem:[%s4164_s23 + $0x180] sm:$0xff]  ;;  %v196_v58 = vld [vmem:[%s4164_s23 + $0x188] sm:$0xff]  ;;  %v197_v59 = vld [vmem:[%s4164_s23 + $0x190] sm:$0xff] }
  0x21   : > { %v198_v60 = vld [vmem:[%s4164_s23 + $0x198] sm:$0xff]  ;;  %v199_v61 = vld [vmem:[%s4164_s23 + $0x1a0] sm:$0xff]  ;;  %v200_v62 = vld [vmem:[%s4164_s23 + $0x1a8] sm:$0xff] }
  0x22   : > { %3554 = vmatmul.mubr.msk.f32.gmra.mrb[8].mxu0 %vm218_vm0, %v156_v15  ;;  %v201_v63 = vld [vmem:[%s4164_s23 + $0x1b0] sm:$0xff]  ;;  %v202_v0 = vld [vmem:[%s4164_s23 + $0x1b8] sm:$0xff]  ;;  %v203_v1 = vld [vmem:[%s4164_s23 + $0x1c0] sm:$0xff] }
  0x23   : > { %3556 = vmatprep.mubr.msk.f32.mxu0 %vm218_vm0, %v157_v16  ;;  %v204_v2 = vld [vmem:[%s4164_s23 + $0x1c8] sm:$0xff]  ;;  %v205_v3 = vld [vmem:[%s4164_s23 + $0x1d0] sm:$0xff]  ;;  %v206_v4 = vld [vmem:[%s4164_s23 + $0x1d8] sm:$0xff] }
  0x24   : > { %v207_v5 = vld [vmem:[%s4164_s23 + $0x1e0] sm:$0xff]  ;;  %v208_v6 = vld [vmem:[%s4164_s23 + $0x1e8] sm:$0xff]  ;;  %v209_v7 = vld [vmem:[%s4164_s23 + $0x1f0] sm:$0xff] }
  0x25   : > { %v210_v8 = vld [vmem:[%s4164_s23 + $0x1f8] sm:$0xff]  ;;  %v1511_v9 = vld [vmem:[%s4931_s1 + $0x40] sm:$0xff]  ;;  %v1512_v10 = vld [vmem:[%s4931_s1 + $0x48] sm:$0xff] }
  0x26   : > { %3557 = vmatmul.mubr.msk.f32.gmra.mrb[10].mxu0 %vm218_vm0, %v158_v17  ;;  %v3961_v11 = vpack.c.bf16 %v1512_v10, %v1511_v9  ;;  %v4309_v12 = vld [vmem:[%s4931_s1 + $0x10] ss:$0 sm:$0xff] }
  0x27   : > { %3559 = vmatprep.mubr.msk.f32.mxu0 %vm218_vm0, %v159_v18  ;;  %v1513_v17 = vld [vmem:[%s4931_s1 + $0x50] sm:$0xff]  ;;  %v1514_v18 = vld [vmem:[%s4931_s1 + $0x58] sm:$0xff] }
  0x28   : > { %3962 = vmatprep.subr.bf16.mxu0 %v3961_v11 }
  0x29   : > { %3964 = vmatpush3.bf16.msra.mxu0 %v3961_v11 }
  0x2a   : > { %3560 = vmatmul.mubr.msk.f32.gmra.mrb[12].mxu0 %vm218_vm0, %v160_v19 }
  0x2b   : > { %3562 = vmatprep.mubr.msk.f32.mxu0 %vm218_vm0, %v161_v20 }
  0x2e   : > { %3563 = vmatmul.mubr.msk.f32.gmra.mrb[14].mxu0 %vm218_vm0, %v162_v21  ;;  %v3965_v21 = vpack.c.bf16 %v1514_v18, %v1513_v17 }
  0x2f   : > { %3565 = vmatprep.mubr.msk.f32.mxu0 %vm218_vm0, %v163_v22 }
  0x30   : > { %3966 = vmatprep.subr.bf16.mxu0 %v3965_v21 }
  0x31   : > { %3968 = vmatpush3.bf16.msra.mxu0 %v3965_v21 }
  0x32   : > { %3566 = vmatmul.mubr.msk.f32.gmra.mrb[16].mxu0 %vm218_vm0, %v164_v23 }
  0x33   : > { %3568 = vmatprep.mubr.msk.f32.mxu0 %vm218_vm0, %v165_v24 }
  0x36   : > { %3569 = vmatmul.mubr.msk.f32.gmra.mrb[18].mxu0 %vm218_vm0, %v166_v25 }
  0x37   : > { %3571 = vmatprep.mubr.msk.f32.mxu0 %vm218_vm0, %v167_v26 }
  0x3a   : > { %3572 = vmatmul.mubr.msk.f32.gmra.mrb[20].mxu0 %vm218_vm0, %v168_v27 }
  0x3b   : > { %3574 = vmatprep.mubr.msk.f32.mxu0 %vm218_vm0, %v169_v28 }
  0x3e   : > { %3575 = vmatmul.mubr.msk.f32.gmra.mrb[22].mxu0 %vm218_vm0, %v170_v29 }
  0x3f   : > { %3577 = vmatprep.mubr.msk.f32.mxu0 %vm218_vm0, %v171_v30 }
  0x42   : > { %3578 = vmatmul.mubr.msk.f32.gmra.mrb[24].mxu0 %vm218_vm0, %v172_v31 }
  0x43   : > { %3580 = vmatprep.mubr.msk.f32.mxu0 %vm218_vm0, %v173_v32 }
  0x46   : > { %3581 = vmatmul.mubr.msk.f32.gmra.mrb[26].mxu0 %vm218_vm0, %v174_v33 }
  0x47   : > { %3583 = vmatprep.mubr.msk.f32.mxu0 %vm218_vm0, %v175_v34 }
  0x4a   : > { %3584 = vmatmul.mubr.msk.f32.gmra.mrb[28].mxu0 %vm218_vm0, %v176_v35 }
  0x4b   : > { %3586 = vmatprep.mubr.msk.f32.mxu0 %vm218_vm0, %v177_v36 }
  0x4e   : > { %3587 = vmatmul.mubr.msk.f32.gmra.mrb[30].mxu0 %vm218_vm0, %v178_v37 }
  0x4f   : > { %3589 = vmatprep.mubr.msk.f32.mxu0 %vm218_vm0, %v179_v38 }
  0x52   : > { %3590 = vmatmul.mubr.msk.f32.gmra.mrb[32].mxu0 %vm218_vm0, %v180_v39 }
  0x53   : > { %3592 = vmatprep.mubr.msk.f32.mxu0 %vm218_vm0, %v181_v40 }
  0x56   : > { %3593 = vmatmul.mubr.msk.f32.gmra.mrb[34].mxu0 %vm218_vm0, %v182_v41 }
  0x57   : > { %3595 = vmatprep.mubr.msk.f32.mxu0 %vm218_vm0, %v183_v42 }
  0x5a   : > { %3596 = vmatmul.mubr.msk.f32.gmra.mrb[36].mxu0 %vm218_vm0, %v184_v43 }
  0x5b   : > { %3598 = vmatprep.mubr.msk.f32.mxu0 %vm218_vm0, %v185_v44 }
  0x5e   : > { %3599 = vmatmul.mubr.msk.f32.gmra.mrb[38].mxu0 %vm218_vm0, %v186_v45 }
  0x5f   : > { %3601 = vmatprep.mubr.msk.f32.mxu0 %vm218_vm0, %v187_v46 }
  0x62   : > { %3602 = vmatmul.mubr.msk.f32.gmra.mrb[40].mxu0 %vm218_vm0, %v188_v47 }
  0x63   : > { %3604 = vmatprep.mubr.msk.f32.mxu0 %vm218_vm0, %v189_v48 }
  0x66   : > { %3605 = vmatmul.mubr.msk.f32.gmra.mrb[42].mxu0 %vm218_vm0, %v190_v49 }
  0x67   : > { %3607 = vmatprep.mubr.msk.f32.mxu0 %vm218_vm0, %v191_v50 }
  0x6a   : > { %3608 = vmatmul.mubr.msk.f32.gmra.mrb[44].mxu0 %vm218_vm0, %v192_v54 }
  0x6b   : > { %3610 = vmatprep.mubr.msk.f32.mxu0 %vm218_vm0, %v193_v55 }
  0x6e   : > { %3611 = vmatmul.mubr.msk.f32.gmra.mrb[46].mxu0 %vm218_vm0, %v194_v56 }
  0x6f   : > { %3613 = vmatprep.mubr.msk.f32.mxu0 %vm218_vm0, %v195_v57 }
  0x72   : > { %3614 = vmatmul.mubr.msk.f32.gmra.mrb[48].mxu0 %vm218_vm0, %v196_v58 }
  0x73   : > { %3616 = vmatprep.mubr.msk.f32.mxu0 %vm218_vm0, %v197_v59 }
  0x76   : > { %3617 = vmatmul.mubr.msk.f32.gmra.mrb[50].mxu0 %vm218_vm0, %v198_v60 }
  0x77   : > { %3619 = vmatprep.mubr.msk.f32.mxu0 %vm218_vm0, %v199_v61 }
  0x7a   : > { %3620 = vmatmul.mubr.msk.f32.gmra.mrb[52].mxu0 %vm218_vm0, %v200_v62 }
  0x7b   : > { %3622 = vmatprep.mubr.msk.f32.mxu0 %vm218_vm0, %v201_v63 }
  0x7e   : > { %3623 = vmatmul.mubr.msk.f32.gmra.mrb[54].mxu0 %vm218_vm0, %v202_v0 }
  0x7f   : > { %3625 = vmatprep.mubr.msk.f32.mxu0 %vm218_vm0, %v203_v1 }
  0x82   : > { %3626 = vmatmul.mubr.msk.f32.gmra.mrb[56].mxu0 %vm218_vm0, %v204_v2 }
  0x83   : > { %3628 = vmatprep.mubr.msk.f32.mxu0 %vm218_vm0, %v205_v3 }
  0x86   : > { %3629 = vmatmul.mubr.msk.f32.gmra.mrb[58].mxu0 %vm218_vm0, %v206_v4 }
  0x87   : > { %3631 = vmatprep.mubr.msk.f32.mxu0 %vm218_vm0, %v207_v5 }
  0x8a   : > { %3632 = vmatmul.mubr.msk.f32.gmra.mrb[60].mxu0 %vm218_vm0, %v208_v6 }
  0x8b   : > { %3634 = vmatprep.mubr.msk.f32.mxu0 %vm218_vm0, %v209_v7 }
  0x8e   : > { %3635 = vmatmul.mubr.msk.f32.gmra.mrb[62].mxu0 %vm218_vm0, %v210_v8 }
  0xe5   : > { %v3543_v13 = vpop.f32.mrb[0].mxu0 }
  0xe6   : > { %v483_v14 = vadd.f32 %v3543_v13, %v4309_v12  ;;  %v477_v15 = vpop.f32.mrb[1].mxu0 }
  0xe7   : > { %v478_v16 = vadd.f32 %v4309_v12, %v477_v15 }
  0xe8   : > { %v797_v22 = vmax.f32 %v483_v14, 0.0 }
  0xe9   : > { %v796_v19 = vmax.f32 %v478_v16, 0.0  ;;  %v3546_v20 = vpop.f32.mrb[2].mxu0 }
  0xea   : > { %v493_v23 = vadd.f32 %v3546_v20, %v4309_v12  ;;  %v487_v24 = vpop.f32.mrb[3].mxu0 }
  0xeb   : > { %v488_v25 = vadd.f32 %v4309_v12, %v487_v24  ;;  %3645 = vmatprep.mubr.msk.f32.mxu1 %vm869_vm1, %v796_v19 }
  0xec   : > { %3646 = vmatmul.mubr.msk.f32.vlgmr.msra.gmra.mrb[0].mxu1 %vm869_vm1, %v797_v22  ;;  %v799_v28 = vmax.f32 %v493_v23, 0.0 }
  0xed   : > { %v798_v26 = vmax.f32 %v488_v25, 0.0  ;;  %v3549_v27 = vpop.f32.mrb[4].mxu0 }
  0xee   : > { %v503_v29 = vadd.f32 %v3549_v27, %v4309_v12  ;;  %v497_v30 = vpop.f32.mrb[5].mxu0 }
  0xef   : > { %v498_v31 = vadd.f32 %v4309_v12, %v497_v30  ;;  %3648 = vmatprep.mubr.msk.f32.mxu1 %vm869_vm1, %v798_v26 }
  0xf0   : > { %3649 = vmatmul.mubr.msk.f32.gmra.mrb[2].mxu1 %vm869_vm1, %v799_v28  ;;  %v801_v34 = vmax.f32 %v503_v29, 0.0 }
  0xf1   : > { %v800_v32 = vmax.f32 %v498_v31, 0.0  ;;  %v3552_v33 = vpop.f32.mrb[6].mxu0 }
  0xf2   : > { %v513_v35 = vadd.f32 %v3552_v33, %v4309_v12  ;;  %v507_v36 = vpop.f32.mrb[7].mxu0 }
  0xf3   : > { %v508_v37 = vadd.f32 %v4309_v12, %v507_v36  ;;  %3651 = vmatprep.mubr.msk.f32.mxu1 %vm869_vm1, %v800_v32 }
  0xf4   : > { %3652 = vmatmul.mubr.msk.f32.gmra.mrb[4].mxu1 %vm869_vm1, %v801_v34  ;;  %v803_v40 = vmax.f32 %v513_v35, 0.0 }
  0xf5   : > { %v802_v38 = vmax.f32 %v508_v37, 0.0  ;;  %v3555_v39 = vpop.f32.mrb[8].mxu0 }
  0xf6   : > { %v523_v41 = vadd.f32 %v3555_v39, %v4309_v12  ;;  %v517_v42 = vpop.f32.mrb[9].mxu0 }
  0xf7   : > { %v518_v43 = vadd.f32 %v4309_v12, %v517_v42  ;;  %3654 = vmatprep.mubr.msk.f32.mxu1 %vm869_vm1, %v802_v38 }
  0xf8   : > { %3655 = vmatmul.mubr.msk.f32.gmra.mrb[6].mxu1 %vm869_vm1, %v803_v40  ;;  %v805_v46 = vmax.f32 %v523_v41, 0.0 }
  0xf9   : > { %v804_v44 = vmax.f32 %v518_v43, 0.0  ;;  %v3558_v45 = vpop.f32.mrb[10].mxu0 }
  0xfa   : > { %v533_v47 = vadd.f32 %v3558_v45, %v4309_v12  ;;  %v527_v48 = vpop.f32.mrb[11].mxu0 }
  0xfb   : > { %v528_v49 = vadd.f32 %v4309_v12, %v527_v48  ;;  %3657 = vmatprep.mubr.msk.f32.mxu1 %vm869_vm1, %v804_v44 }
  0xfc   : > { %3658 = vmatmul.mubr.msk.f32.gmra.mrb[8].mxu1 %vm869_vm1, %v805_v46  ;;  %v807_v52 = vmax.f32 %v533_v47, 0.0 }
  0xfd   : > { %v806_v50 = vmax.f32 %v528_v49, 0.0  ;;  %v3561_v51 = vpop.f32.mrb[12].mxu0 }
  0xfe   : > { %v543_v53 = vadd.f32 %v3561_v51, %v4309_v12  ;;  %v537_v54 = vpop.f32.mrb[13].mxu0 }
  0xff   : > { %v538_v55 = vadd.f32 %v4309_v12, %v537_v54  ;;  %3660 = vmatprep.mubr.msk.f32.mxu1 %vm869_vm1, %v806_v50 }
 0x100   : > { %3661 = vmatmul.mubr.msk.f32.gmra.mrb[10].mxu1 %vm869_vm1, %v807_v52  ;;  %v809_v58 = vmax.f32 %v543_v53, 0.0 }
 0x101   : > { %v808_v56 = vmax.f32 %v538_v55, 0.0  ;;  %v3564_v57 = vpop.f32.mrb[14].mxu0 }
 0x102   : > { %v553_v59 = vadd.f32 %v3564_v57, %v4309_v12  ;;  %v547_v60 = vpop.f32.mrb[15].mxu0 }
 0x103   : > { %v548_v61 = vadd.f32 %v4309_v12, %v547_v60  ;;  %3663 = vmatprep.mubr.msk.f32.mxu1 %vm869_vm1, %v808_v56 }
 0x104   : > { %3664 = vmatmul.mubr.msk.f32.gmra.mrb[12].mxu1 %vm869_vm1, %v809_v58  ;;  %v811_v0 = vmax.f32 %v553_v59, 0.0 }
 0x105   : > { %v810_v62 = vmax.f32 %v548_v61, 0.0  ;;  %v3567_v63 = vpop.f32.mrb[16].mxu0 }
 0x106   : > { %v563_v1 = vadd.f32 %v3567_v63, %v4309_v12  ;;  %v557_v2 = vpop.f32.mrb[17].mxu0 }
 0x107   : > { %v558_v3 = vadd.f32 %v4309_v12, %v557_v2  ;;  %3666 = vmatprep.mubr.msk.f32.mxu1 %vm869_vm1, %v810_v62 }
 0x108   : > { %3667 = vmatmul.mubr.msk.f32.gmra.mrb[14].mxu1 %vm869_vm1, %v811_v0  ;;  %v813_v6 = vmax.f32 %v563_v1, 0.0 }
 0x109   : > { %v812_v4 = vmax.f32 %v558_v3, 0.0  ;;  %v3570_v5 = vpop.f32.mrb[18].mxu0 }
 0x10a   : > { %v573_v7 = vadd.f32 %v3570_v5, %v4309_v12  ;;  %v567_v8 = vpop.f32.mrb[19].mxu0 }
 0x10b   : > { %v568_v9 = vadd.f32 %v4309_v12, %v567_v8  ;;  %3669 = vmatprep.mubr.msk.f32.mxu1 %vm869_vm1, %v812_v4 }
 0x10c   : > { %3670 = vmatmul.mubr.msk.f32.gmra.mrb[16].mxu1 %vm869_vm1, %v813_v6  ;;  %v815_v13 = vmax.f32 %v573_v7, 0.0 }
 0x10d   : > { %v814_v10 = vmax.f32 %v568_v9, 0.0  ;;  %v3573_v11 = vpop.f32.mrb[20].mxu0 }
 0x10e   : > { %v583_v14 = vadd.f32 %v3573_v11, %v4309_v12  ;;  %v577_v15 = vpop.f32.mrb[21].mxu0 }
 0x10f   : > { %v578_v16 = vadd.f32 %v4309_v12, %v577_v15  ;;  %3672 = vmatprep.mubr.msk.f32.mxu1 %vm869_vm1, %v814_v10 }
 0x110   : > { %3673 = vmatmul.mubr.msk.f32.gmra.mrb[18].mxu1 %vm869_vm1, %v815_v13  ;;  %v817_v19 = vmax.f32 %v583_v14, 0.0 }
 0x111   : > { %v816_v17 = vmax.f32 %v578_v16, 0.0  ;;  %v3576_v18 = vpop.f32.mrb[22].mxu0 }
 0x112   : > { %v593_v20 = vadd.f32 %v3576_v18, %v4309_v12  ;;  %v587_v21 = vpop.f32.mrb[23].mxu0 }
 0x113   : > { %v588_v22 = vadd.f32 %v4309_v12, %v587_v21  ;;  %3675 = vmatprep.mubr.msk.f32.mxu1 %vm869_vm1, %v816_v17 }
 0x114   : > { %3676 = vmatmul.mubr.msk.f32.gmra.mrb[20].mxu1 %vm869_vm1, %v817_v19  ;;  %v819_v25 = vmax.f32 %v593_v20, 0.0 }
 0x115   : > { %v818_v23 = vmax.f32 %v588_v22, 0.0  ;;  %v3579_v24 = vpop.f32.mrb[24].mxu0 }
 0x116   : > { %v603_v26 = vadd.f32 %v3579_v24, %v4309_v12  ;;  %v597_v27 = vpop.f32.mrb[25].mxu0 }
 0x117   : > { %v598_v28 = vadd.f32 %v4309_v12, %v597_v27  ;;  %3678 = vmatprep.mubr.msk.f32.mxu1 %vm869_vm1, %v818_v23 }
 0x118   : > { %3679 = vmatmul.mubr.msk.f32.gmra.mrb[22].mxu1 %vm869_vm1, %v819_v25  ;;  %v821_v31 = vmax.f32 %v603_v26, 0.0 }
 0x119   : > { %v820_v29 = vmax.f32 %v598_v28, 0.0  ;;  %v3582_v30 = vpop.f32.mrb[26].mxu0 }
 0x11a   : > { %v613_v32 = vadd.f32 %v3582_v30, %v4309_v12  ;;  %v607_v33 = vpop.f32.mrb[27].mxu0 }
 0x11b   : > { %v608_v34 = vadd.f32 %v4309_v12, %v607_v33  ;;  %3681 = vmatprep.mubr.msk.f32.mxu1 %vm869_vm1, %v820_v29 }
 0x11c   : > { %3682 = vmatmul.mubr.msk.f32.gmra.mrb[24].mxu1 %vm869_vm1, %v821_v31  ;;  %v823_v37 = vmax.f32 %v613_v32, 0.0 }
 0x11d   : > { %v822_v35 = vmax.f32 %v608_v34, 0.0  ;;  %v3585_v36 = vpop.f32.mrb[28].mxu0 }
 0x11e   : > { %v623_v38 = vadd.f32 %v3585_v36, %v4309_v12  ;;  %v617_v39 = vpop.f32.mrb[29].mxu0 }
 0x11f   : > { %v618_v40 = vadd.f32 %v4309_v12, %v617_v39  ;;  %3684 = vmatprep.mubr.msk.f32.mxu1 %vm869_vm1, %v822_v35 }
 0x120   : > { %3685 = vmatmul.mubr.msk.f32.gmra.mrb[26].mxu1 %vm869_vm1, %v823_v37  ;;  %v825_v43 = vmax.f32 %v623_v38, 0.0 }
 0x121   : > { %v824_v41 = vmax.f32 %v618_v40, 0.0  ;;  %v3588_v42 = vpop.f32.mrb[30].mxu0 }
 0x122   : > { %v633_v44 = vadd.f32 %v3588_v42, %v4309_v12  ;;  %v627_v45 = vpop.f32.mrb[31].mxu0 }
 0x123   : > { %v628_v46 = vadd.f32 %v4309_v12, %v627_v45  ;;  %3687 = vmatprep.mubr.msk.f32.mxu1 %vm869_vm1, %v824_v41 }
 0x124   : > { %3688 = vmatmul.mubr.msk.f32.gmra.mrb[28].mxu1 %vm869_vm1, %v825_v43  ;;  %v827_v49 = vmax.f32 %v633_v44, 0.0 }
 0x125   : > { %v826_v47 = vmax.f32 %v628_v46, 0.0  ;;  %v3591_v48 = vpop.f32.mrb[32].mxu0 }
 0x126   : > { %v643_v50 = vadd.f32 %v3591_v48, %v4309_v12  ;;  %v637_v51 = vpop.f32.mrb[33].mxu0 }
 0x127   : > { %v638_v52 = vadd.f32 %v4309_v12, %v637_v51  ;;  %3690 = vmatprep.mubr.msk.f32.mxu1 %vm869_vm1, %v826_v47 }
 0x128   : > { %3691 = vmatmul.mubr.msk.f32.gmra.mrb[30].mxu1 %vm869_vm1, %v827_v49  ;;  %v829_v55 = vmax.f32 %v643_v50, 0.0 }
 0x129   : > { %v828_v53 = vmax.f32 %v638_v52, 0.0  ;;  %v3594_v54 = vpop.f32.mrb[34].mxu0 }
 0x12a   : > { %v653_v56 = vadd.f32 %v3594_v54, %v4309_v12  ;;  %v647_v57 = vpop.f32.mrb[35].mxu0 }
 0x12b   : > { %v648_v58 = vadd.f32 %v4309_v12, %v647_v57  ;;  %3693 = vmatprep.mubr.msk.f32.mxu1 %vm869_vm1, %v828_v53 }
 0x12c   : > { %3694 = vmatmul.mubr.msk.f32.gmra.mrb[32].mxu1 %vm869_vm1, %v829_v55  ;;  %v831_v61 = vmax.f32 %v653_v56, 0.0 }
 0x12d   : > { %v830_v59 = vmax.f32 %v648_v58, 0.0  ;;  %v3597_v60 = vpop.f32.mrb[36].mxu0 }
 0x12e   : > { %v663_v62 = vadd.f32 %v3597_v60, %v4309_v12  ;;  %v657_v63 = vpop.f32.mrb[37].mxu0 }
 0x12f   : > { %v658_v0 = vadd.f32 %v4309_v12, %v657_v63  ;;  %3696 = vmatprep.mubr.msk.f32.mxu1 %vm869_vm1, %v830_v59 }
 0x130   : > { %3697 = vmatmul.mubr.msk.f32.gmra.mrb[34].mxu1 %vm869_vm1, %v831_v61  ;;  %v833_v3 = vmax.f32 %v663_v62, 0.0 }
 0x131   : > { %v832_v1 = vmax.f32 %v658_v0, 0.0  ;;  %v3600_v2 = vpop.f32.mrb[38].mxu0 }
 0x132   : > { %v673_v4 = vadd.f32 %v3600_v2, %v4309_v12  ;;  %v667_v5 = vpop.f32.mrb[39].mxu0 }
 0x133   : > { %v668_v6 = vadd.f32 %v4309_v12, %v667_v5  ;;  %3699 = vmatprep.mubr.msk.f32.mxu1 %vm869_vm1, %v832_v1 }
 0x134   : > { %3700 = vmatmul.mubr.msk.f32.gmra.mrb[36].mxu1 %vm869_vm1, %v833_v3  ;;  %v835_v9 = vmax.f32 %v673_v4, 0.0 }
 0x135   : > { %v834_v7 = vmax.f32 %v668_v6, 0.0  ;;  %v3603_v8 = vpop.f32.mrb[40].mxu0 }
 0x136   : > { %v683_v10 = vadd.f32 %v3603_v8, %v4309_v12  ;;  %v677_v11 = vpop.f32.mrb[41].mxu0 }
 0x137   : > { %v678_v13 = vadd.f32 %v4309_v12, %v677_v11  ;;  %3702 = vmatprep.mubr.msk.f32.mxu1 %vm869_vm1, %v834_v7 }
 0x138   : > { %3703 = vmatmul.mubr.msk.f32.gmra.mrb[38].mxu1 %vm869_vm1, %v835_v9  ;;  %v837_v16 = vmax.f32 %v683_v10, 0.0 }
 0x139   : > { %v836_v14 = vmax.f32 %v678_v13, 0.0  ;;  %v3606_v15 = vpop.f32.mrb[42].mxu0 }
 0x13a   : > { %v693_v17 = vadd.f32 %v3606_v15, %v4309_v12  ;;  %v687_v18 = vpop.f32.mrb[43].mxu0 }
 0x13b   : > { %v688_v19 = vadd.f32 %v4309_v12, %v687_v18  ;;  %3705 = vmatprep.mubr.msk.f32.mxu1 %vm869_vm1, %v836_v14 }
 0x13c   : > { %3706 = vmatmul.mubr.msk.f32.gmra.mrb[40].mxu1 %vm869_vm1, %v837_v16  ;;  %v839_v22 = vmax.f32 %v693_v17, 0.0 }
 0x13d   : > { %v838_v20 = vmax.f32 %v688_v19, 0.0  ;;  %v3609_v21 = vpop.f32.mrb[44].mxu0  ;;  %v2161_v19 = vld [vmem:[%s4931_s1 + $0x68] sm:$0xff] }
 0x13e   : > { %v703_v23 = vadd.f32 %v3609_v21, %v4309_v12  ;;  %v697_v24 = vpop.f32.mrb[45].mxu0 }
 0x13f   : > { %v698_v25 = vadd.f32 %v4309_v12, %v697_v24  ;;  %3708 = vmatprep.mubr.msk.f32.mxu1 %vm869_vm1, %v838_v20  ;;  %v2162_v20 = vld [vmem:[%s4931_s1 + $0x70] sm:$0xff] }
 0x140   : > { %3709 = vmatmul.mubr.msk.f32.gmra.mrb[42].mxu1 %vm869_vm1, %v839_v22  ;;  %v841_v28 = vmax.f32 %v703_v23, 0.0  ;;  %v3969_v21 = vpack.c.bf16 %v2162_v20, %v2161_v19 }
 0x141   : > { %v840_v26 = vmax.f32 %v698_v25, 0.0  ;;  %v3612_v27 = vpop.f32.mrb[46].mxu0 }
 0x142   : > { %v713_v29 = vadd.f32 %v3612_v27, %v4309_v12  ;;  %v707_v30 = vpop.f32.mrb[47].mxu0  ;;  %3970 = vmatprep.subr.bf16.mxu1 %v3969_v21  ;;  %v2164_v27 = vld [vmem:[%s4931_s1 + $0x80] sm:$0xff] }
 0x143   : > { %v708_v31 = vadd.f32 %v4309_v12, %v707_v30  ;;  %3711 = vmatprep.mubr.msk.f32.mxu1 %vm869_vm1, %v840_v26  ;;  %3972 = vmatpush3.bf16.msra.mxu1 %v3969_v21  ;;  %v2163_v26 = vld [vmem:[%s4931_s1 + $0x78] sm:$0xff] }
 0x144   : > { %3712 = vmatmul.mubr.msk.f32.gmra.mrb[44].mxu1 %vm869_vm1, %v841_v28  ;;  %v843_v34 = vmax.f32 %v713_v29, 0.0  ;;  %v3973_v30 = vpack.c.bf16 %v2164_v27, %v2163_v26 }
 0x145   : > { %v842_v32 = vmax.f32 %v708_v31, 0.0  ;;  %v3615_v33 = vpop.f32.mrb[48].mxu0 }
 0x146   : > { %v723_v35 = vadd.f32 %v3615_v33, %v4309_v12  ;;  %v717_v36 = vpop.f32.mrb[49].mxu0  ;;  %3974 = vmatprep.subr.bf16.mxu1 %v3973_v30 }
 0x147   : > { %v718_v37 = vadd.f32 %v4309_v12, %v717_v36  ;;  %3714 = vmatprep.mubr.msk.f32.mxu1 %vm869_vm1, %v842_v32  ;;  %3976 = vmatpush3.bf16.msra.mxu1 %v3973_v30 }
 0x148   : > { %3715 = vmatmul.mubr.msk.f32.gmra.mrb[46].mxu1 %vm869_vm1, %v843_v34  ;;  %v845_v40 = vmax.f32 %v723_v35, 0.0 }
 0x149   : > { %v844_v38 = vmax.f32 %v718_v37, 0.0  ;;  %v3618_v39 = vpop.f32.mrb[50].mxu0 }
 0x14a   : > { %v733_v41 = vadd.f32 %v3618_v39, %v4309_v12  ;;  %v727_v42 = vpop.f32.mrb[51].mxu0 }
 0x14b   : > { %v728_v43 = vadd.f32 %v4309_v12, %v727_v42  ;;  %3717 = vmatprep.mubr.msk.f32.mxu1 %vm869_vm1, %v844_v38 }
 0x14c   : > { %3718 = vmatmul.mubr.msk.f32.gmra.mrb[48].mxu1 %vm869_vm1, %v845_v40  ;;  %v847_v46 = vmax.f32 %v733_v41, 0.0 }
 0x14d   : > { %v846_v44 = vmax.f32 %v728_v43, 0.0  ;;  %v3621_v45 = vpop.f32.mrb[52].mxu0 }
 0x14e   : > { %v743_v47 = vadd.f32 %v3621_v45, %v4309_v12  ;;  %v737_v48 = vpop.f32.mrb[53].mxu0 }
 0x14f   : > { %v738_v49 = vadd.f32 %v4309_v12, %v737_v48  ;;  %3720 = vmatprep.mubr.msk.f32.mxu1 %vm869_vm1, %v846_v44 }
 0x150   : > { %3721 = vmatmul.mubr.msk.f32.gmra.mrb[50].mxu1 %vm869_vm1, %v847_v46  ;;  %v849_v52 = vmax.f32 %v743_v47, 0.0 }
 0x151   : > { %v848_v50 = vmax.f32 %v738_v49, 0.0  ;;  %v3624_v51 = vpop.f32.mrb[54].mxu0 }
 0x152   : > { %v753_v53 = vadd.f32 %v3624_v51, %v4309_v12  ;;  %v747_v54 = vpop.f32.mrb[55].mxu0 }
 0x153   : > { %v748_v55 = vadd.f32 %v4309_v12, %v747_v54  ;;  %3723 = vmatprep.mubr.msk.f32.mxu1 %vm869_vm1, %v848_v50 }
 0x154   : > { %3724 = vmatmul.mubr.msk.f32.gmra.mrb[52].mxu1 %vm869_vm1, %v849_v52  ;;  %v851_v58 = vmax.f32 %v753_v53, 0.0 }
 0x155   : > { %v850_v56 = vmax.f32 %v748_v55, 0.0  ;;  %v3627_v57 = vpop.f32.mrb[56].mxu0 }
 0x156   : > { %v763_v59 = vadd.f32 %v3627_v57, %v4309_v12  ;;  %v757_v60 = vpop.f32.mrb[57].mxu0 }
 0x157   : > { %v758_v61 = vadd.f32 %v4309_v12, %v757_v60  ;;  %3726 = vmatprep.mubr.msk.f32.mxu1 %vm869_vm1, %v850_v56 }
 0x158   : > { %3727 = vmatmul.mubr.msk.f32.gmra.mrb[54].mxu1 %vm869_vm1, %v851_v58  ;;  %v853_v0 = vmax.f32 %v763_v59, 0.0 }
 0x159   : > { %v852_v62 = vmax.f32 %v758_v61, 0.0  ;;  %v3630_v63 = vpop.f32.mrb[58].mxu0 }
 0x15a   : > { %v773_v1 = vadd.f32 %v3630_v63, %v4309_v12  ;;  %v767_v2 = vpop.f32.mrb[59].mxu0 }
 0x15b   : > { %v768_v3 = vadd.f32 %v4309_v12, %v767_v2  ;;  %3729 = vmatprep.mubr.msk.f32.mxu1 %vm869_vm1, %v852_v62 }
 0x15c   : > { %3730 = vmatmul.mubr.msk.f32.gmra.mrb[56].mxu1 %vm869_vm1, %v853_v0  ;;  %v855_v6 = vmax.f32 %v773_v1, 0.0 }
 0x15d   : > { %v854_v4 = vmax.f32 %v768_v3, 0.0  ;;  %v3633_v5 = vpop.f32.mrb[60].mxu0 }
 0x15e   : > { %v783_v7 = vadd.f32 %v3633_v5, %v4309_v12  ;;  %v777_v8 = vpop.f32.mrb[61].mxu0 }
 0x15f   : > { %v778_v9 = vadd.f32 %v4309_v12, %v777_v8  ;;  %3732 = vmatprep.mubr.msk.f32.mxu1 %vm869_vm1, %v854_v4 }
 0x160   : > { %3733 = vmatmul.mubr.msk.f32.gmra.mrb[58].mxu1 %vm869_vm1, %v855_v6  ;;  %v857_v13 = vmax.f32 %v783_v7, 0.0 }
 0x161   : > { %v856_v10 = vmax.f32 %v778_v9, 0.0  ;;  %v3636_v11 = vpop.f32.mrb[62].mxu0 }
 0x162   : > { %v793_v14 = vadd.f32 %v3636_v11, %v4309_v12  ;;  %v787_v15 = vpop.f32.mrb[63].mxu0 }
 0x163   : > { %v788_v16 = vadd.f32 %v4309_v12, %v787_v15  ;;  %3735 = vmatprep.mubr.msk.f32.mxu1 %vm869_vm1, %v856_v10  ;;  %v4454_v12 = vld [vmem:[%s4931_s1 + $0x38] ss:$0 sm:$0xff] }
 0x164   : > { %3736 = vmatmul.mubr.msk.f32.gmra.mrb[60].mxu1 %vm869_vm1, %v857_v13  ;;  %v859_v18 = vmax.f32 %v793_v14, 0.0 }
 0x165   : > { %v858_v17 = vmax.f32 %v788_v16, 0.0 }
 0x167   : > { %3738 = vmatprep.mubr.msk.f32.mxu1 %vm869_vm1, %v858_v17 }
 0x168   : > { %3739 = vmatmul.mubr.msk.f32.gmra.mrb[62].mxu1 %vm869_vm1, %v859_v18 }
 0x1bf   : > { %v3647_v22 = vpop.f32.mrb[0].mxu1 }
 0x1c0   : > { %v1134_v23 = vadd.f32 %v3647_v22, %v4454_v12  ;;  %v1128_v24 = vpop.f32.mrb[1].mxu1 }
 0x1c1   : > { %v1129_v25 = vadd.f32 %v4454_v12, %v1128_v24 }
 0x1c2   : > { %v1448_v31 = vmax.f32 %v1134_v23, 0.0 }
 0x1c3   : > { %v1447_v28 = vmax.f32 %v1129_v25, 0.0  ;;  %v3650_v29 = vpop.f32.mrb[2].mxu1 }
 0x1c4   : > { %v1144_v32 = vadd.f32 %v3650_v29, %v4454_v12  ;;  %v1138_v33 = vpop.f32.mrb[3].mxu1 }
 0x1c5   : > { %v1139_v34 = vadd.f32 %v4454_v12, %v1138_v33  ;;  %3749 = vmatprep.mubr.msk.f32.mxu0 %vm869_vm1, %v1447_v28 }
 0x1c6   : > { %3750 = vmatmul.mubr.msk.f32.vlgmr.msra.gmra.mrb[64].mxu0 %vm869_vm1, %v1448_v31  ;;  %v1450_v37 = vmax.f32 %v1144_v32, 0.0 }
 0x1c7   : > { %v1449_v35 = vmax.f32 %v1139_v34, 0.0  ;;  %v3653_v36 = vpop.f32.mrb[4].mxu1 }
 0x1c8   : > { %v1154_v38 = vadd.f32 %v3653_v36, %v4454_v12  ;;  %v1148_v39 = vpop.f32.mrb[5].mxu1 }
 0x1c9   : > { %v1149_v40 = vadd.f32 %v4454_v12, %v1148_v39  ;;  %3752 = vmatprep.mubr.msk.f32.mxu0 %vm869_vm1, %v1449_v35 }
 0x1ca   : > { %3753 = vmatmul.mubr.msk.f32.gmra.mrb[66].mxu0 %vm869_vm1, %v1450_v37  ;;  %v1452_v43 = vmax.f32 %v1154_v38, 0.0 }
 0x1cb   : > { %v1451_v41 = vmax.f32 %v1149_v40, 0.0  ;;  %v3656_v42 = vpop.f32.mrb[6].mxu1 }
 0x1cc   : > { %v1164_v44 = vadd.f32 %v3656_v42, %v4454_v12  ;;  %v1158_v45 = vpop.f32.mrb[7].mxu1 }
 0x1cd   : > { %v1159_v46 = vadd.f32 %v4454_v12, %v1158_v45  ;;  %3755 = vmatprep.mubr.msk.f32.mxu0 %vm869_vm1, %v1451_v41 }
 0x1ce   : > { %3756 = vmatmul.mubr.msk.f32.gmra.mrb[68].mxu0 %vm869_vm1, %v1452_v43  ;;  %v1454_v49 = vmax.f32 %v1164_v44, 0.0 }
 0x1cf   : > { %v1453_v47 = vmax.f32 %v1159_v46, 0.0  ;;  %v3659_v48 = vpop.f32.mrb[8].mxu1 }
 0x1d0   : > { %v1174_v50 = vadd.f32 %v3659_v48, %v4454_v12  ;;  %v1168_v51 = vpop.f32.mrb[9].mxu1 }
 0x1d1   : > { %v1169_v52 = vadd.f32 %v4454_v12, %v1168_v51  ;;  %3758 = vmatprep.mubr.msk.f32.mxu0 %vm869_vm1, %v1453_v47 }
 0x1d2   : > { %3759 = vmatmul.mubr.msk.f32.gmra.mrb[70].mxu0 %vm869_vm1, %v1454_v49  ;;  %v1456_v55 = vmax.f32 %v1174_v50, 0.0 }
 0x1d3   : > { %v1455_v53 = vmax.f32 %v1169_v52, 0.0  ;;  %v3662_v54 = vpop.f32.mrb[10].mxu1 }
 0x1d4   : > { %v1184_v56 = vadd.f32 %v3662_v54, %v4454_v12  ;;  %v1178_v57 = vpop.f32.mrb[11].mxu1 }
 0x1d5   : > { %v1179_v58 = vadd.f32 %v4454_v12, %v1178_v57  ;;  %3761 = vmatprep.mubr.msk.f32.mxu0 %vm869_vm1, %v1455_v53 }
 0x1d6   : > { %3762 = vmatmul.mubr.msk.f32.gmra.mrb[72].mxu0 %vm869_vm1, %v1456_v55  ;;  %v1458_v61 = vmax.f32 %v1184_v56, 0.0 }
 0x1d7   : > { %v1457_v59 = vmax.f32 %v1179_v58, 0.0  ;;  %v3665_v60 = vpop.f32.mrb[12].mxu1 }
 0x1d8   : > { %v1194_v62 = vadd.f32 %v3665_v60, %v4454_v12  ;;  %v1188_v63 = vpop.f32.mrb[13].mxu1 }
 0x1d9   : > { %v1189_v0 = vadd.f32 %v4454_v12, %v1188_v63  ;;  %3764 = vmatprep.mubr.msk.f32.mxu0 %vm869_vm1, %v1457_v59 }
 0x1da   : > { %3765 = vmatmul.mubr.msk.f32.gmra.mrb[74].mxu0 %vm869_vm1, %v1458_v61  ;;  %v1460_v3 = vmax.f32 %v1194_v62, 0.0 }
 0x1db   : > { %v1459_v1 = vmax.f32 %v1189_v0, 0.0  ;;  %v3668_v2 = vpop.f32.mrb[14].mxu1 }
 0x1dc   : > { %v1204_v4 = vadd.f32 %v3668_v2, %v4454_v12  ;;  %v1198_v5 = vpop.f32.mrb[15].mxu1 }
 0x1dd   : > { %v1199_v6 = vadd.f32 %v4454_v12, %v1198_v5  ;;  %3767 = vmatprep.mubr.msk.f32.mxu0 %vm869_vm1, %v1459_v1 }
 0x1de   : > { %3768 = vmatmul.mubr.msk.f32.gmra.mrb[76].mxu0 %vm869_vm1, %v1460_v3  ;;  %v1462_v9 = vmax.f32 %v1204_v4, 0.0 }
 0x1df   : > { %v1461_v7 = vmax.f32 %v1199_v6, 0.0  ;;  %v3671_v8 = vpop.f32.mrb[16].mxu1 }
 0x1e0   : > { %v1214_v10 = vadd.f32 %v3671_v8, %v4454_v12  ;;  %v1208_v11 = vpop.f32.mrb[17].mxu1 }
 0x1e1   : > { %v1209_v13 = vadd.f32 %v4454_v12, %v1208_v11  ;;  %3770 = vmatprep.mubr.msk.f32.mxu0 %vm869_vm1, %v1461_v7 }
 0x1e2   : > { %3771 = vmatmul.mubr.msk.f32.gmra.mrb[78].mxu0 %vm869_vm1, %v1462_v9  ;;  %v1464_v16 = vmax.f32 %v1214_v10, 0.0 }
 0x1e3   : > { %v1463_v14 = vmax.f32 %v1209_v13, 0.0  ;;  %v3674_v15 = vpop.f32.mrb[18].mxu1 }
 0x1e4   : > { %v1224_v17 = vadd.f32 %v3674_v15, %v4454_v12  ;;  %v1218_v18 = vpop.f32.mrb[19].mxu1 }
 0x1e5   : > { %v1219_v19 = vadd.f32 %v4454_v12, %v1218_v18  ;;  %3773 = vmatprep.mubr.msk.f32.mxu0 %vm869_vm1, %v1463_v14 }
 0x1e6   : > { %3774 = vmatmul.mubr.msk.f32.gmra.mrb[80].mxu0 %vm869_vm1, %v1464_v16  ;;  %v1466_v22 = vmax.f32 %v1224_v17, 0.0 }
 0x1e7   : > { %v1465_v20 = vmax.f32 %v1219_v19, 0.0  ;;  %v3677_v21 = vpop.f32.mrb[20].mxu1 }
 0x1e8   : > { %v1234_v23 = vadd.f32 %v3677_v21, %v4454_v12  ;;  %v1228_v24 = vpop.f32.mrb[21].mxu1 }
 0x1e9   : > { %v1229_v25 = vadd.f32 %v4454_v12, %v1228_v24  ;;  %3776 = vmatprep.mubr.msk.f32.mxu0 %vm869_vm1, %v1465_v20 }
 0x1ea   : > { %3777 = vmatmul.mubr.msk.f32.gmra.mrb[82].mxu0 %vm869_vm1, %v1466_v22  ;;  %v1468_v28 = vmax.f32 %v1234_v23, 0.0 }
 0x1eb   : > { %v1467_v26 = vmax.f32 %v1229_v25, 0.0  ;;  %v3680_v27 = vpop.f32.mrb[22].mxu1 }
 0x1ec   : > { %v1244_v29 = vadd.f32 %v3680_v27, %v4454_v12  ;;  %v1238_v30 = vpop.f32.mrb[23].mxu1 }
 0x1ed   : > { %v1239_v31 = vadd.f32 %v4454_v12, %v1238_v30  ;;  %3779 = vmatprep.mubr.msk.f32.mxu0 %vm869_vm1, %v1467_v26 }
 0x1ee   : > { %3780 = vmatmul.mubr.msk.f32.gmra.mrb[84].mxu0 %vm869_vm1, %v1468_v28  ;;  %v1470_v34 = vmax.f32 %v1244_v29, 0.0 }
 0x1ef   : > { %v1469_v32 = vmax.f32 %v1239_v31, 0.0  ;;  %v3683_v33 = vpop.f32.mrb[24].mxu1 }
 0x1f0   : > { %v1254_v35 = vadd.f32 %v3683_v33, %v4454_v12  ;;  %v1248_v36 = vpop.f32.mrb[25].mxu1 }
 0x1f1   : > { %v1249_v37 = vadd.f32 %v4454_v12, %v1248_v36  ;;  %3782 = vmatprep.mubr.msk.f32.mxu0 %vm869_vm1, %v1469_v32 }
 0x1f2   : > { %3783 = vmatmul.mubr.msk.f32.gmra.mrb[86].mxu0 %vm869_vm1, %v1470_v34  ;;  %v1472_v40 = vmax.f32 %v1254_v35, 0.0 }
 0x1f3   : > { %v1471_v38 = vmax.f32 %v1249_v37, 0.0  ;;  %v3686_v39 = vpop.f32.mrb[26].mxu1 }
 0x1f4   : > { %v1264_v41 = vadd.f32 %v3686_v39, %v4454_v12  ;;  %v1258_v42 = vpop.f32.mrb[27].mxu1 }
 0x1f5   : > { %v1259_v43 = vadd.f32 %v4454_v12, %v1258_v42  ;;  %3785 = vmatprep.mubr.msk.f32.mxu0 %vm869_vm1, %v1471_v38 }
 0x1f6   : > { %3786 = vmatmul.mubr.msk.f32.gmra.mrb[88].mxu0 %vm869_vm1, %v1472_v40  ;;  %v1474_v46 = vmax.f32 %v1264_v41, 0.0 }
 0x1f7   : > { %v1473_v44 = vmax.f32 %v1259_v43, 0.0  ;;  %v3689_v45 = vpop.f32.mrb[28].mxu1 }
 0x1f8   : > { %v1274_v47 = vadd.f32 %v3689_v45, %v4454_v12  ;;  %v1268_v48 = vpop.f32.mrb[29].mxu1 }
 0x1f9   : > { %v1269_v49 = vadd.f32 %v4454_v12, %v1268_v48  ;;  %3788 = vmatprep.mubr.msk.f32.mxu0 %vm869_vm1, %v1473_v44 }
 0x1fa   : > { %3789 = vmatmul.mubr.msk.f32.gmra.mrb[90].mxu0 %vm869_vm1, %v1474_v46  ;;  %v1476_v52 = vmax.f32 %v1274_v47, 0.0 }
 0x1fb   : > { %v1475_v50 = vmax.f32 %v1269_v49, 0.0  ;;  %v3692_v51 = vpop.f32.mrb[30].mxu1 }
 0x1fc   : > { %v1284_v53 = vadd.f32 %v3692_v51, %v4454_v12  ;;  %v1278_v54 = vpop.f32.mrb[31].mxu1 }
 0x1fd   : > { %v1279_v55 = vadd.f32 %v4454_v12, %v1278_v54  ;;  %3791 = vmatprep.mubr.msk.f32.mxu0 %vm869_vm1, %v1475_v50 }
 0x1fe   : > { %3792 = vmatmul.mubr.msk.f32.gmra.mrb[92].mxu0 %vm869_vm1, %v1476_v52  ;;  %v1478_v58 = vmax.f32 %v1284_v53, 0.0 }
 0x1ff   : > { %v1477_v56 = vmax.f32 %v1279_v55, 0.0  ;;  %v3695_v57 = vpop.f32.mrb[32].mxu1 }
 0x200   : > { %v1294_v59 = vadd.f32 %v3695_v57, %v4454_v12  ;;  %v1288_v60 = vpop.f32.mrb[33].mxu1 }
 0x201   : > { %v1289_v61 = vadd.f32 %v4454_v12, %v1288_v60  ;;  %3794 = vmatprep.mubr.msk.f32.mxu0 %vm869_vm1, %v1477_v56 }
 0x202   : > { %3795 = vmatmul.mubr.msk.f32.gmra.mrb[94].mxu0 %vm869_vm1, %v1478_v58  ;;  %v1480_v0 = vmax.f32 %v1294_v59, 0.0 }
 0x203   : > { %v1479_v62 = vmax.f32 %v1289_v61, 0.0  ;;  %v3698_v63 = vpop.f32.mrb[34].mxu1 }
 0x204   : > { %v1304_v1 = vadd.f32 %v3698_v63, %v4454_v12  ;;  %v1298_v2 = vpop.f32.mrb[35].mxu1 }
 0x205   : > { %v1299_v3 = vadd.f32 %v4454_v12, %v1298_v2  ;;  %3797 = vmatprep.mubr.msk.f32.mxu0 %vm869_vm1, %v1479_v62 }
 0x206   : > { %3798 = vmatmul.mubr.msk.f32.gmra.mrb[96].mxu0 %vm869_vm1, %v1480_v0  ;;  %v1482_v6 = vmax.f32 %v1304_v1, 0.0 }
 0x207   : > { %v1481_v4 = vmax.f32 %v1299_v3, 0.0  ;;  %v3701_v5 = vpop.f32.mrb[36].mxu1 }
 0x208   : > { %v1314_v7 = vadd.f32 %v3701_v5, %v4454_v12  ;;  %v1308_v8 = vpop.f32.mrb[37].mxu1 }
 0x209   : > { %v1309_v9 = vadd.f32 %v4454_v12, %v1308_v8  ;;  %3800 = vmatprep.mubr.msk.f32.mxu0 %vm869_vm1, %v1481_v4 }
 0x20a   : > { %3801 = vmatmul.mubr.msk.f32.gmra.mrb[98].mxu0 %vm869_vm1, %v1482_v6  ;;  %v1484_v13 = vmax.f32 %v1314_v7, 0.0 }
 0x20b   : > { %v1483_v10 = vmax.f32 %v1309_v9, 0.0  ;;  %v3704_v11 = vpop.f32.mrb[38].mxu1 }
 0x20c   : > { %v1324_v14 = vadd.f32 %v3704_v11, %v4454_v12  ;;  %v1318_v15 = vpop.f32.mrb[39].mxu1 }
 0x20d   : > { %v1319_v16 = vadd.f32 %v4454_v12, %v1318_v15  ;;  %3803 = vmatprep.mubr.msk.f32.mxu0 %vm869_vm1, %v1483_v10 }
 0x20e   : > { %3804 = vmatmul.mubr.msk.f32.gmra.mrb[100].mxu0 %vm869_vm1, %v1484_v13  ;;  %v1486_v19 = vmax.f32 %v1324_v14, 0.0 }
 0x20f   : > { %v1485_v17 = vmax.f32 %v1319_v16, 0.0  ;;  %v3707_v18 = vpop.f32.mrb[40].mxu1 }
 0x210   : > { %v1334_v20 = vadd.f32 %v3707_v18, %v4454_v12  ;;  %v1328_v21 = vpop.f32.mrb[41].mxu1 }
 0x211   : > { %v1329_v22 = vadd.f32 %v4454_v12, %v1328_v21  ;;  %3806 = vmatprep.mubr.msk.f32.mxu0 %vm869_vm1, %v1485_v17 }
 0x212   : > { %3807 = vmatmul.mubr.msk.f32.gmra.mrb[102].mxu0 %vm869_vm1, %v1486_v19  ;;  %v1488_v25 = vmax.f32 %v1334_v20, 0.0 }
 0x213   : > { %v1487_v23 = vmax.f32 %v1329_v22, 0.0  ;;  %v3710_v24 = vpop.f32.mrb[42].mxu1 }
 0x214   : > { %v1344_v26 = vadd.f32 %v3710_v24, %v4454_v12  ;;  %v1338_v27 = vpop.f32.mrb[43].mxu1 }
 0x215   : > { %v1339_v28 = vadd.f32 %v4454_v12, %v1338_v27  ;;  %3809 = vmatprep.mubr.msk.f32.mxu0 %vm869_vm1, %v1487_v23 }
 0x216   : > { %3810 = vmatmul.mubr.msk.f32.gmra.mrb[104].mxu0 %vm869_vm1, %v1488_v25  ;;  %v1490_v31 = vmax.f32 %v1344_v26, 0.0 }
 0x217   : > { %v1489_v29 = vmax.f32 %v1339_v28, 0.0  ;;  %v3713_v30 = vpop.f32.mrb[44].mxu1  ;;  %v4593_v28 = vld [vmem:[%s4931_s1 + $0x60] ss:$0 sm:$0xff] }
 0x218   : > { %v1354_v32 = vadd.f32 %v3713_v30, %v4454_v12  ;;  %v1348_v33 = vpop.f32.mrb[45].mxu1 }
 0x219   : > { %v1349_v34 = vadd.f32 %v4454_v12, %v1348_v33  ;;  %3812 = vmatprep.mubr.msk.f32.mxu0 %vm869_vm1, %v1489_v29 }
 0x21a   : > { %3813 = vmatmul.mubr.msk.f32.gmra.mrb[106].mxu0 %vm869_vm1, %v1490_v31  ;;  %v1492_v37 = vmax.f32 %v1354_v32, 0.0 }
 0x21b   : > { %v1491_v35 = vmax.f32 %v1349_v34, 0.0  ;;  %v3716_v36 = vpop.f32.mrb[46].mxu1 }
 0x21c   : > { %v1364_v38 = vadd.f32 %v3716_v36, %v4454_v12  ;;  %v1358_v39 = vpop.f32.mrb[47].mxu1 }
 0x21d   : > { %v1359_v40 = vadd.f32 %v4454_v12, %v1358_v39  ;;  %3815 = vmatprep.mubr.msk.f32.mxu0 %vm869_vm1, %v1491_v35 }
 0x21e   : > { %3816 = vmatmul.mubr.msk.f32.gmra.mrb[108].mxu0 %vm869_vm1, %v1492_v37  ;;  %v1494_v43 = vmax.f32 %v1364_v38, 0.0 }
 0x21f   : > { %v1493_v41 = vmax.f32 %v1359_v40, 0.0  ;;  %v3719_v42 = vpop.f32.mrb[48].mxu1 }
 0x220   : > { %v1374_v44 = vadd.f32 %v3719_v42, %v4454_v12  ;;  %v1368_v45 = vpop.f32.mrb[49].mxu1 }
 0x221   : > { %v1369_v46 = vadd.f32 %v4454_v12, %v1368_v45  ;;  %3818 = vmatprep.mubr.msk.f32.mxu0 %vm869_vm1, %v1493_v41 }
 0x222   : > { %3819 = vmatmul.mubr.msk.f32.gmra.mrb[110].mxu0 %vm869_vm1, %v1494_v43  ;;  %v1496_v49 = vmax.f32 %v1374_v44, 0.0 }
 0x223   : > { %v1495_v47 = vmax.f32 %v1369_v46, 0.0  ;;  %v3722_v48 = vpop.f32.mrb[50].mxu1 }
 0x224   : > { %v1384_v50 = vadd.f32 %v3722_v48, %v4454_v12  ;;  %v1378_v51 = vpop.f32.mrb[51].mxu1 }
 0x225   : > { %v1379_v52 = vadd.f32 %v4454_v12, %v1378_v51  ;;  %3821 = vmatprep.mubr.msk.f32.mxu0 %vm869_vm1, %v1495_v47 }
 0x226   : > { %3822 = vmatmul.mubr.msk.f32.gmra.mrb[112].mxu0 %vm869_vm1, %v1496_v49  ;;  %v1498_v55 = vmax.f32 %v1384_v50, 0.0 }
 0x227   : > { %v1497_v53 = vmax.f32 %v1379_v52, 0.0  ;;  %v3725_v54 = vpop.f32.mrb[52].mxu1 }
 0x228   : > { %v1394_v56 = vadd.f32 %v3725_v54, %v4454_v12  ;;  %v1388_v57 = vpop.f32.mrb[53].mxu1 }
 0x229   : > { %v1389_v58 = vadd.f32 %v4454_v12, %v1388_v57  ;;  %3824 = vmatprep.mubr.msk.f32.mxu0 %vm869_vm1, %v1497_v53 }
 0x22a   : > { %3825 = vmatmul.mubr.msk.f32.gmra.mrb[114].mxu0 %vm869_vm1, %v1498_v55  ;;  %v1500_v61 = vmax.f32 %v1394_v56, 0.0 }
 0x22b   : > { %v1499_v59 = vmax.f32 %v1389_v58, 0.0  ;;  %v3728_v60 = vpop.f32.mrb[54].mxu1 }
 0x22c   : > { %v1404_v62 = vadd.f32 %v3728_v60, %v4454_v12  ;;  %v1398_v63 = vpop.f32.mrb[55].mxu1 }
 0x22d   : > { %v1399_v0 = vadd.f32 %v4454_v12, %v1398_v63  ;;  %3827 = vmatprep.mubr.msk.f32.mxu0 %vm869_vm1, %v1499_v59 }
 0x22e   : > { %3828 = vmatmul.mubr.msk.f32.gmra.mrb[116].mxu0 %vm869_vm1, %v1500_v61  ;;  %v1502_v3 = vmax.f32 %v1404_v62, 0.0 }
 0x22f   : > { %v1501_v1 = vmax.f32 %v1399_v0, 0.0  ;;  %v3731_v2 = vpop.f32.mrb[56].mxu1 }
 0x230   : > { %v1414_v4 = vadd.f32 %v3731_v2, %v4454_v12  ;;  %v1408_v5 = vpop.f32.mrb[57].mxu1 }
 0x231   : > { %v1409_v6 = vadd.f32 %v4454_v12, %v1408_v5  ;;  %3830 = vmatprep.mubr.msk.f32.mxu0 %vm869_vm1, %v1501_v1 }
 0x232   : > { %3831 = vmatmul.mubr.msk.f32.gmra.mrb[118].mxu0 %vm869_vm1, %v1502_v3  ;;  %v1504_v9 = vmax.f32 %v1414_v4, 0.0 }
 0x233   : > { %v1503_v7 = vmax.f32 %v1409_v6, 0.0  ;;  %v3734_v8 = vpop.f32.mrb[58].mxu1 }
 0x234   : > { %v1424_v10 = vadd.f32 %v3734_v8, %v4454_v12  ;;  %v1418_v11 = vpop.f32.mrb[59].mxu1 }
 0x235   : > { %v1419_v13 = vadd.f32 %v4454_v12, %v1418_v11  ;;  %3833 = vmatprep.mubr.msk.f32.mxu0 %vm869_vm1, %v1503_v7 }
 0x236   : > { %3834 = vmatmul.mubr.msk.f32.gmra.mrb[120].mxu0 %vm869_vm1, %v1504_v9  ;;  %v1506_v16 = vmax.f32 %v1424_v10, 0.0 }
 0x237   : > { %v1505_v14 = vmax.f32 %v1419_v13, 0.0  ;;  %v3737_v15 = vpop.f32.mrb[60].mxu1 }
 0x238   : > { %v1434_v17 = vadd.f32 %v3737_v15, %v4454_v12  ;;  %v1428_v18 = vpop.f32.mrb[61].mxu1 }
 0x239   : > { %v1429_v19 = vadd.f32 %v4454_v12, %v1428_v18  ;;  %3836 = vmatprep.mubr.msk.f32.mxu0 %vm869_vm1, %v1505_v14 }
 0x23a   : > { %3837 = vmatmul.mubr.msk.f32.gmra.mrb[122].mxu0 %vm869_vm1, %v1506_v16  ;;  %v1508_v22 = vmax.f32 %v1434_v17, 0.0 }
 0x23b   : > { %v1507_v20 = vmax.f32 %v1429_v19, 0.0  ;;  %v3740_v21 = vpop.f32.mrb[62].mxu1 }
 0x23c   : > { %v1444_v23 = vadd.f32 %v3740_v21, %v4454_v12  ;;  %v1438_v24 = vpop.f32.mrb[63].mxu1 }
 0x23d   : > { %v1439_v25 = vadd.f32 %v4454_v12, %v1438_v24  ;;  %3839 = vmatprep.mubr.msk.f32.mxu0 %vm869_vm1, %v1507_v20 }
 0x23e   : > { %3840 = vmatmul.mubr.msk.f32.gmra.mrb[124].mxu0 %vm869_vm1, %v1508_v22  ;;  %v1510_v27 = vmax.f32 %v1444_v23, 0.0 }
 0x23f   : > { %v1509_v26 = vmax.f32 %v1439_v25, 0.0 }
 0x241   : > { %3842 = vmatprep.mubr.msk.f32.mxu0 %vm869_vm1, %v1509_v26 }
 0x242   : > { %3843 = vmatmul.mubr.msk.f32.gmra.mrb[126].mxu0 %vm869_vm1, %v1510_v27 }
 0x299   : > { %v3751_v29 = vpop.f32.mrb[64].mxu0 }
 0x29a   : > { %v1784_v30 = vadd.f32 %v3751_v29, %v4593_v28  ;;  %v1778_v31 = vpop.f32.mrb[65].mxu0 }
 0x29b   : > { %v1779_v12 = vadd.f32 %v4593_v28, %v1778_v31 }
 0x29c   : > { %v2098_v34 = vmax.f32 %v1784_v30, 0.0 }
 0x29d   : > { %v2097_v32 = vmax.f32 %v1779_v12, 0.0  ;;  %v3754_v33 = vpop.f32.mrb[66].mxu0 }
 0x29e   : > { %v1794_v35 = vadd.f32 %v3754_v33, %v4593_v28  ;;  %v1788_v36 = vpop.f32.mrb[67].mxu0 }
 0x29f   : > { %v1789_v37 = vadd.f32 %v4593_v28, %v1788_v36  ;;  %3853 = vmatprep.mubr.msk.f32.mxu1 %vm869_vm1, %v2097_v32 }
 0x2a0   : > { %3854 = vmatmul.mubr.msk.f32.vlgmr.msra.gmra.mrb[64].mxu1 %vm869_vm1, %v2098_v34  ;;  %v2100_v40 = vmax.f32 %v1794_v35, 0.0 }
 0x2a1   : > { %v2099_v38 = vmax.f32 %v1789_v37, 0.0  ;;  %v3757_v39 = vpop.f32.mrb[68].mxu0 }
 0x2a2   : > { %v1804_v41 = vadd.f32 %v3757_v39, %v4593_v28  ;;  %v1798_v42 = vpop.f32.mrb[69].mxu0 }
 0x2a3   : > { %v1799_v43 = vadd.f32 %v4593_v28, %v1798_v42  ;;  %3856 = vmatprep.mubr.msk.f32.mxu1 %vm869_vm1, %v2099_v38 }
 0x2a4   : > { %3857 = vmatmul.mubr.msk.f32.gmra.mrb[66].mxu1 %vm869_vm1, %v2100_v40  ;;  %v2102_v46 = vmax.f32 %v1804_v41, 0.0 }
 0x2a5   : > { %v2101_v44 = vmax.f32 %v1799_v43, 0.0  ;;  %v3760_v45 = vpop.f32.mrb[70].mxu0 }
 0x2a6   : > { %v1814_v47 = vadd.f32 %v3760_v45, %v4593_v28  ;;  %v1808_v48 = vpop.f32.mrb[71].mxu0 }
 0x2a7   : > { %v1809_v49 = vadd.f32 %v4593_v28, %v1808_v48  ;;  %3859 = vmatprep.mubr.msk.f32.mxu1 %vm869_vm1, %v2101_v44 }
 0x2a8   : > { %3860 = vmatmul.mubr.msk.f32.gmra.mrb[68].mxu1 %vm869_vm1, %v2102_v46  ;;  %v2104_v52 = vmax.f32 %v1814_v47, 0.0 }
 0x2a9   : > { %v2103_v50 = vmax.f32 %v1809_v49, 0.0  ;;  %v3763_v51 = vpop.f32.mrb[72].mxu0 }
 0x2aa   : > { %v1824_v53 = vadd.f32 %v3763_v51, %v4593_v28  ;;  %v1818_v54 = vpop.f32.mrb[73].mxu0 }
 0x2ab   : > { %v1819_v55 = vadd.f32 %v4593_v28, %v1818_v54  ;;  %3862 = vmatprep.mubr.msk.f32.mxu1 %vm869_vm1, %v2103_v50 }
 0x2ac   : > { %3863 = vmatmul.mubr.msk.f32.gmra.mrb[70].mxu1 %vm869_vm1, %v2104_v52  ;;  %v2106_v58 = vmax.f32 %v1824_v53, 0.0 }
 0x2ad   : > { %v2105_v56 = vmax.f32 %v1819_v55, 0.0  ;;  %v3766_v57 = vpop.f32.mrb[74].mxu0 }
 0x2ae   : > { %v1834_v59 = vadd.f32 %v3766_v57, %v4593_v28  ;;  %v1828_v60 = vpop.f32.mrb[75].mxu0 }
 0x2af   : > { %v1829_v61 = vadd.f32 %v4593_v28, %v1828_v60  ;;  %3865 = vmatprep.mubr.msk.f32.mxu1 %vm869_vm1, %v2105_v56 }
 0x2b0   : > { %3866 = vmatmul.mubr.msk.f32.gmra.mrb[72].mxu1 %vm869_vm1, %v2106_v58  ;;  %v2108_v0 = vmax.f32 %v1834_v59, 0.0 }
 0x2b1   : > { %v2107_v62 = vmax.f32 %v1829_v61, 0.0  ;;  %v3769_v63 = vpop.f32.mrb[76].mxu0 }
 0x2b2   : > { %v1844_v1 = vadd.f32 %v3769_v63, %v4593_v28  ;;  %v1838_v2 = vpop.f32.mrb[77].mxu0 }
 0x2b3   : > { %v1839_v3 = vadd.f32 %v4593_v28, %v1838_v2  ;;  %3868 = vmatprep.mubr.msk.f32.mxu1 %vm869_vm1, %v2107_v62 }
 0x2b4   : > { %3869 = vmatmul.mubr.msk.f32.gmra.mrb[74].mxu1 %vm869_vm1, %v2108_v0  ;;  %v2110_v6 = vmax.f32 %v1844_v1, 0.0 }
 0x2b5   : > { %v2109_v4 = vmax.f32 %v1839_v3, 0.0  ;;  %v3772_v5 = vpop.f32.mrb[78].mxu0 }
 0x2b6   : > { %v1854_v7 = vadd.f32 %v3772_v5, %v4593_v28  ;;  %v1848_v8 = vpop.f32.mrb[79].mxu0 }
 0x2b7   : > { %v1849_v9 = vadd.f32 %v4593_v28, %v1848_v8  ;;  %3871 = vmatprep.mubr.msk.f32.mxu1 %vm869_vm1, %v2109_v4 }
 0x2b8   : > { %3872 = vmatmul.mubr.msk.f32.gmra.mrb[76].mxu1 %vm869_vm1, %v2110_v6  ;;  %v2112_v13 = vmax.f32 %v1854_v7, 0.0 }
 0x2b9   : > { %v2111_v10 = vmax.f32 %v1849_v9, 0.0  ;;  %v3775_v11 = vpop.f32.mrb[80].mxu0 }
 0x2ba   : > { %v1864_v14 = vadd.f32 %v3775_v11, %v4593_v28  ;;  %v1858_v15 = vpop.f32.mrb[81].mxu0 }
 0x2bb   : > { %v1859_v16 = vadd.f32 %v4593_v28, %v1858_v15  ;;  %3874 = vmatprep.mubr.msk.f32.mxu1 %vm869_vm1, %v2111_v10 }
 0x2bc   : > { %3875 = vmatmul.mubr.msk.f32.gmra.mrb[78].mxu1 %vm869_vm1, %v2112_v13  ;;  %v2114_v19 = vmax.f32 %v1864_v14, 0.0 }
 0x2bd   : > { %v2113_v17 = vmax.f32 %v1859_v16, 0.0  ;;  %v3778_v18 = vpop.f32.mrb[82].mxu0 }
 0x2be   : > { %v1874_v20 = vadd.f32 %v3778_v18, %v4593_v28  ;;  %v1868_v21 = vpop.f32.mrb[83].mxu0 }
 0x2bf   : > { %v1869_v22 = vadd.f32 %v4593_v28, %v1868_v21  ;;  %3877 = vmatprep.mubr.msk.f32.mxu1 %vm869_vm1, %v2113_v17 }
 0x2c0   : > { %3878 = vmatmul.mubr.msk.f32.gmra.mrb[80].mxu1 %vm869_vm1, %v2114_v19  ;;  %v2116_v25 = vmax.f32 %v1874_v20, 0.0 }
 0x2c1   : > { %v2115_v23 = vmax.f32 %v1869_v22, 0.0  ;;  %v3781_v24 = vpop.f32.mrb[84].mxu0 }
 0x2c2   : > { %v1884_v26 = vadd.f32 %v3781_v24, %v4593_v28  ;;  %v1878_v27 = vpop.f32.mrb[85].mxu0 }
 0x2c3   : > { %v1879_v29 = vadd.f32 %v4593_v28, %v1878_v27  ;;  %3880 = vmatprep.mubr.msk.f32.mxu1 %vm869_vm1, %v2115_v23 }
 0x2c4   : > { %3881 = vmatmul.mubr.msk.f32.gmra.mrb[82].mxu1 %vm869_vm1, %v2116_v25  ;;  %v2118_v12 = vmax.f32 %v1884_v26, 0.0 }
 0x2c5   : > { %v2117_v30 = vmax.f32 %v1879_v29, 0.0  ;;  %v3784_v31 = vpop.f32.mrb[86].mxu0 }
 0x2c6   : > { %v1894_v32 = vadd.f32 %v3784_v31, %v4593_v28  ;;  %v1888_v33 = vpop.f32.mrb[87].mxu0 }
 0x2c7   : > { %v1889_v34 = vadd.f32 %v4593_v28, %v1888_v33  ;;  %3883 = vmatprep.mubr.msk.f32.mxu1 %vm869_vm1, %v2117_v30 }
 0x2c8   : > { %3884 = vmatmul.mubr.msk.f32.gmra.mrb[84].mxu1 %vm869_vm1, %v2118_v12  ;;  %v2120_v37 = vmax.f32 %v1894_v32, 0.0 }
 0x2c9   : > { %v2119_v35 = vmax.f32 %v1889_v34, 0.0  ;;  %v3787_v36 = vpop.f32.mrb[88].mxu0 }
 0x2ca   : > { %v1904_v38 = vadd.f32 %v3787_v36, %v4593_v28  ;;  %v1898_v39 = vpop.f32.mrb[89].mxu0 }
 0x2cb   : > { %v1899_v40 = vadd.f32 %v4593_v28, %v1898_v39  ;;  %3886 = vmatprep.mubr.msk.f32.mxu1 %vm869_vm1, %v2119_v35 }
 0x2cc   : > { %3887 = vmatmul.mubr.msk.f32.gmra.mrb[86].mxu1 %vm869_vm1, %v2120_v37  ;;  %v2122_v43 = vmax.f32 %v1904_v38, 0.0 }
 0x2cd   : > { %v2121_v41 = vmax.f32 %v1899_v40, 0.0  ;;  %v3790_v42 = vpop.f32.mrb[90].mxu0 }
 0x2ce   : > { %v1914_v44 = vadd.f32 %v3790_v42, %v4593_v28  ;;  %v1908_v45 = vpop.f32.mrb[91].mxu0 }
 0x2cf   : > { %v1909_v46 = vadd.f32 %v4593_v28, %v1908_v45  ;;  %3889 = vmatprep.mubr.msk.f32.mxu1 %vm869_vm1, %v2121_v41 }
 0x2d0   : > { %3890 = vmatmul.mubr.msk.f32.gmra.mrb[88].mxu1 %vm869_vm1, %v2122_v43  ;;  %v2124_v49 = vmax.f32 %v1914_v44, 0.0 }
 0x2d1   : > { %v2123_v47 = vmax.f32 %v1909_v46, 0.0  ;;  %v3793_v48 = vpop.f32.mrb[92].mxu0 }
 0x2d2   : > { %v1924_v50 = vadd.f32 %v3793_v48, %v4593_v28  ;;  %v1918_v51 = vpop.f32.mrb[93].mxu0 }
 0x2d3   : > { %v1919_v52 = vadd.f32 %v4593_v28, %v1918_v51  ;;  %3892 = vmatprep.mubr.msk.f32.mxu1 %vm869_vm1, %v2123_v47 }
 0x2d4   : > { %3893 = vmatmul.mubr.msk.f32.gmra.mrb[90].mxu1 %vm869_vm1, %v2124_v49  ;;  %v2126_v55 = vmax.f32 %v1924_v50, 0.0 }
 0x2d5   : > { %v2125_v53 = vmax.f32 %v1919_v52, 0.0  ;;  %v3796_v54 = vpop.f32.mrb[94].mxu0 }
 0x2d6   : > { %v1934_v56 = vadd.f32 %v3796_v54, %v4593_v28  ;;  %v1928_v57 = vpop.f32.mrb[95].mxu0 }
 0x2d7   : > { %v1929_v58 = vadd.f32 %v4593_v28, %v1928_v57  ;;  %3895 = vmatprep.mubr.msk.f32.mxu1 %vm869_vm1, %v2125_v53 }
 0x2d8   : > { %3896 = vmatmul.mubr.msk.f32.gmra.mrb[92].mxu1 %vm869_vm1, %v2126_v55  ;;  %v2128_v61 = vmax.f32 %v1934_v56, 0.0 }
 0x2d9   : > { %v2127_v59 = vmax.f32 %v1929_v58, 0.0  ;;  %v3799_v60 = vpop.f32.mrb[96].mxu0 }
 0x2da   : > { %v1944_v62 = vadd.f32 %v3799_v60, %v4593_v28  ;;  %v1938_v63 = vpop.f32.mrb[97].mxu0 }
 0x2db   : > { %v1939_v0 = vadd.f32 %v4593_v28, %v1938_v63  ;;  %3898 = vmatprep.mubr.msk.f32.mxu1 %vm869_vm1, %v2127_v59 }
 0x2dc   : > { %3899 = vmatmul.mubr.msk.f32.gmra.mrb[94].mxu1 %vm869_vm1, %v2128_v61  ;;  %v2130_v3 = vmax.f32 %v1944_v62, 0.0 }
 0x2dd   : > { %v2129_v1 = vmax.f32 %v1939_v0, 0.0  ;;  %v3802_v2 = vpop.f32.mrb[98].mxu0 }
 0x2de   : > { %v1954_v4 = vadd.f32 %v3802_v2, %v4593_v28  ;;  %v1948_v5 = vpop.f32.mrb[99].mxu0 }
 0x2df   : > { %v1949_v6 = vadd.f32 %v4593_v28, %v1948_v5  ;;  %3901 = vmatprep.mubr.msk.f32.mxu1 %vm869_vm1, %v2129_v1 }
 0x2e0   : > { %3902 = vmatmul.mubr.msk.f32.gmra.mrb[96].mxu1 %vm869_vm1, %v2130_v3  ;;  %v2132_v9 = vmax.f32 %v1954_v4, 0.0 }
 0x2e1   : > { %v2131_v7 = vmax.f32 %v1949_v6, 0.0  ;;  %v3805_v8 = vpop.f32.mrb[100].mxu0 }
 0x2e2   : > { %v1964_v10 = vadd.f32 %v3805_v8, %v4593_v28  ;;  %v1958_v11 = vpop.f32.mrb[101].mxu0 }
 0x2e3   : > { %v1959_v13 = vadd.f32 %v4593_v28, %v1958_v11  ;;  %3904 = vmatprep.mubr.msk.f32.mxu1 %vm869_vm1, %v2131_v7 }
 0x2e4   : > { %3905 = vmatmul.mubr.msk.f32.gmra.mrb[98].mxu1 %vm869_vm1, %v2132_v9  ;;  %v2134_v16 = vmax.f32 %v1964_v10, 0.0 }
 0x2e5   : > { %v2133_v14 = vmax.f32 %v1959_v13, 0.0  ;;  %v3808_v15 = vpop.f32.mrb[102].mxu0 }
 0x2e6   : > { %v1974_v17 = vadd.f32 %v3808_v15, %v4593_v28  ;;  %v1968_v18 = vpop.f32.mrb[103].mxu0 }
 0x2e7   : > { %v1969_v19 = vadd.f32 %v4593_v28, %v1968_v18  ;;  %3907 = vmatprep.mubr.msk.f32.mxu1 %vm869_vm1, %v2133_v14 }
 0x2e8   : > { %3908 = vmatmul.mubr.msk.f32.gmra.mrb[100].mxu1 %vm869_vm1, %v2134_v16  ;;  %v2136_v22 = vmax.f32 %v1974_v17, 0.0 }
 0x2e9   : > { %v2135_v20 = vmax.f32 %v1969_v19, 0.0  ;;  %v3811_v21 = vpop.f32.mrb[104].mxu0 }
 0x2ea   : > { %v1984_v23 = vadd.f32 %v3811_v21, %v4593_v28  ;;  %v1978_v24 = vpop.f32.mrb[105].mxu0 }
 0x2eb   : > { %v1979_v25 = vadd.f32 %v4593_v28, %v1978_v24  ;;  %3910 = vmatprep.mubr.msk.f32.mxu1 %vm869_vm1, %v2135_v20 }
 0x2ec   : > { %3911 = vmatmul.mubr.msk.f32.gmra.mrb[102].mxu1 %vm869_vm1, %v2136_v22  ;;  %v2138_v29 = vmax.f32 %v1984_v23, 0.0 }
 0x2ed   : > { %v2137_v26 = vmax.f32 %v1979_v25, 0.0  ;;  %v3814_v27 = vpop.f32.mrb[106].mxu0 }
 0x2ee   : > { %v1994_v30 = vadd.f32 %v3814_v27, %v4593_v28  ;;  %v1988_v31 = vpop.f32.mrb[107].mxu0 }
 0x2ef   : > { %v1989_v12 = vadd.f32 %v4593_v28, %v1988_v31  ;;  %3913 = vmatprep.mubr.msk.f32.mxu1 %vm869_vm1, %v2137_v26 }
 0x2f0   : > { %3914 = vmatmul.mubr.msk.f32.gmra.mrb[104].mxu1 %vm869_vm1, %v2138_v29  ;;  %v2140_v34 = vmax.f32 %v1994_v30, 0.0 }
 0x2f1   : > { %v2139_v32 = vmax.f32 %v1989_v12, 0.0  ;;  %v3817_v33 = vpop.f32.mrb[108].mxu0  ;;  %v4726_v12 = vld [vmem:[%s4931_s1 + $0x88] ss:$0 sm:$0xff] }
 0x2f2   : > { %v2004_v35 = vadd.f32 %v3817_v33, %v4593_v28  ;;  %v1998_v36 = vpop.f32.mrb[109].mxu0 }
 0x2f3   : > { %v1999_v37 = vadd.f32 %v4593_v28, %v1998_v36  ;;  %3916 = vmatprep.mubr.msk.f32.mxu1 %vm869_vm1, %v2139_v32 }
 0x2f4   : > { %3917 = vmatmul.mubr.msk.f32.gmra.mrb[106].mxu1 %vm869_vm1, %v2140_v34  ;;  %v2142_v40 = vmax.f32 %v2004_v35, 0.0 }
 0x2f5   : > { %v2141_v38 = vmax.f32 %v1999_v37, 0.0  ;;  %v3820_v39 = vpop.f32.mrb[110].mxu0 }
 0x2f6   : > { %v2014_v41 = vadd.f32 %v3820_v39, %v4593_v28  ;;  %v2008_v42 = vpop.f32.mrb[111].mxu0 }
 0x2f7   : > { %v2009_v43 = vadd.f32 %v4593_v28, %v2008_v42  ;;  %3919 = vmatprep.mubr.msk.f32.mxu1 %vm869_vm1, %v2141_v38 }
 0x2f8   : > { %3920 = vmatmul.mubr.msk.f32.gmra.mrb[108].mxu1 %vm869_vm1, %v2142_v40  ;;  %v2144_v46 = vmax.f32 %v2014_v41, 0.0 }
 0x2f9   : > { %v2143_v44 = vmax.f32 %v2009_v43, 0.0  ;;  %v3823_v45 = vpop.f32.mrb[112].mxu0 }
 0x2fa   : > { %v2024_v47 = vadd.f32 %v3823_v45, %v4593_v28  ;;  %v2018_v48 = vpop.f32.mrb[113].mxu0 }
 0x2fb   : > { %v2019_v49 = vadd.f32 %v4593_v28, %v2018_v48  ;;  %3922 = vmatprep.mubr.msk.f32.mxu1 %vm869_vm1, %v2143_v44 }
 0x2fc   : > { %3923 = vmatmul.mubr.msk.f32.gmra.mrb[110].mxu1 %vm869_vm1, %v2144_v46  ;;  %v2146_v52 = vmax.f32 %v2024_v47, 0.0 }
 0x2fd   : > { %v2145_v50 = vmax.f32 %v2019_v49, 0.0  ;;  %v3826_v51 = vpop.f32.mrb[114].mxu0 }
 0x2fe   : > { %v2034_v53 = vadd.f32 %v3826_v51, %v4593_v28  ;;  %v2028_v54 = vpop.f32.mrb[115].mxu0 }
 0x2ff   : > { %v2029_v55 = vadd.f32 %v4593_v28, %v2028_v54  ;;  %3925 = vmatprep.mubr.msk.f32.mxu1 %vm869_vm1, %v2145_v50 }
 0x300   : > { %3926 = vmatmul.mubr.msk.f32.gmra.mrb[112].mxu1 %vm869_vm1, %v2146_v52  ;;  %v2148_v58 = vmax.f32 %v2034_v53, 0.0 }
 0x301   : > { %v2147_v56 = vmax.f32 %v2029_v55, 0.0  ;;  %v3829_v57 = vpop.f32.mrb[116].mxu0 }
 0x302   : > { %v2044_v59 = vadd.f32 %v3829_v57, %v4593_v28  ;;  %v2038_v60 = vpop.f32.mrb[117].mxu0 }
 0x303   : > { %v2039_v61 = vadd.f32 %v4593_v28, %v2038_v60  ;;  %3928 = vmatprep.mubr.msk.f32.mxu1 %vm869_vm1, %v2147_v56 }
 0x304   : > { %3929 = vmatmul.mubr.msk.f32.gmra.mrb[114].mxu1 %vm869_vm1, %v2148_v58  ;;  %v2150_v0 = vmax.f32 %v2044_v59, 0.0 }
 0x305   : > { %v2149_v62 = vmax.f32 %v2039_v61, 0.0  ;;  %v3832_v63 = vpop.f32.mrb[118].mxu0 }
 0x306   : > { %v2054_v1 = vadd.f32 %v3832_v63, %v4593_v28  ;;  %v2048_v2 = vpop.f32.mrb[119].mxu0 }
 0x307   : > { %v2049_v3 = vadd.f32 %v4593_v28, %v2048_v2  ;;  %3931 = vmatprep.mubr.msk.f32.mxu1 %vm869_vm1, %v2149_v62 }
 0x308   : > { %3932 = vmatmul.mubr.msk.f32.gmra.mrb[116].mxu1 %vm869_vm1, %v2150_v0  ;;  %v2152_v6 = vmax.f32 %v2054_v1, 0.0 }
 0x309   : > { %v2151_v4 = vmax.f32 %v2049_v3, 0.0  ;;  %v3835_v5 = vpop.f32.mrb[120].mxu0 }
 0x30a   : > { %v2064_v7 = vadd.f32 %v3835_v5, %v4593_v28  ;;  %v2058_v8 = vpop.f32.mrb[121].mxu0 }
 0x30b   : > { %v2059_v9 = vadd.f32 %v4593_v28, %v2058_v8  ;;  %3934 = vmatprep.mubr.msk.f32.mxu1 %vm869_vm1, %v2151_v4 }
 0x30c   : > { %3935 = vmatmul.mubr.msk.f32.gmra.mrb[118].mxu1 %vm869_vm1, %v2152_v6  ;;  %v2154_v13 = vmax.f32 %v2064_v7, 0.0 }
 0x30d   : > { %v2153_v10 = vmax.f32 %v2059_v9, 0.0  ;;  %v3838_v11 = vpop.f32.mrb[122].mxu0 }
 0x30e   : > { %v2074_v14 = vadd.f32 %v3838_v11, %v4593_v28  ;;  %v2068_v15 = vpop.f32.mrb[123].mxu0 }
 0x30f   : > { %v2069_v16 = vadd.f32 %v4593_v28, %v2068_v15  ;;  %3937 = vmatprep.mubr.msk.f32.mxu1 %vm869_vm1, %v2153_v10 }
 0x310   : > { %3938 = vmatmul.mubr.msk.f32.gmra.mrb[120].mxu1 %vm869_vm1, %v2154_v13  ;;  %v2156_v19 = vmax.f32 %v2074_v14, 0.0 }
 0x311   : > { %v2155_v17 = vmax.f32 %v2069_v16, 0.0  ;;  %v3841_v18 = vpop.f32.mrb[124].mxu0 }
 0x312   : > { %v2084_v20 = vadd.f32 %v3841_v18, %v4593_v28  ;;  %v2078_v21 = vpop.f32.mrb[125].mxu0 }
 0x313   : > { %v2079_v22 = vadd.f32 %v4593_v28, %v2078_v21  ;;  %3940 = vmatprep.mubr.msk.f32.mxu1 %vm869_vm1, %v2155_v17 }
 0x314   : > { %3941 = vmatmul.mubr.msk.f32.gmra.mrb[122].mxu1 %vm869_vm1, %v2156_v19  ;;  %v2158_v25 = vmax.f32 %v2084_v20, 0.0 }
 0x315   : > { %v2157_v23 = vmax.f32 %v2079_v22, 0.0  ;;  %v3844_v24 = vpop.f32.mrb[126].mxu0 }
 0x316   : > { %v2094_v26 = vadd.f32 %v3844_v24, %v4593_v28  ;;  %v2088_v27 = vpop.f32.mrb[127].mxu0 }
 0x317   : > { %v2089_v29 = vadd.f32 %v4593_v28, %v2088_v27  ;;  %3943 = vmatprep.mubr.msk.f32.mxu1 %vm869_vm1, %v2157_v23 }
 0x318   : > { %3944 = vmatmul.mubr.msk.f32.gmra.mrb[124].mxu1 %vm869_vm1, %v2158_v25  ;;  %v2160_v31 = vmax.f32 %v2094_v26, 0.0 }
 0x319   : > { %v2159_v30 = vmax.f32 %v2089_v29, 0.0 }
 0x31b   : > { %3946 = vmatprep.mubr.msk.f32.mxu1 %vm869_vm1, %v2159_v30 }
 0x31c   : > { %3947 = vmatmul.mubr.msk.f32.gmra.mrb[126].mxu1 %vm869_vm1, %v2160_v31 }
 0x373   : > { %v3855_v32 = vpop.f32.mrb[64].mxu1 }
 0x374   : > { %v2434_v33 = vadd.f32 %v3855_v32, %v4726_v12  ;;  %v2428_v34 = vpop.f32.mrb[65].mxu1 }
 0x375   : > { %v2429_v28 = vadd.f32 %v4726_v12, %v2428_v34 }
 0x376   : > { %3985 = vtanh.f32 %v2434_v33 }
 0x377   : > { %3987 = vtanh.f32 %v2429_v28  ;;  %v3858_v35 = vpop.f32.mrb[66].mxu1 }
 0x378   : > { %v2444_v36 = vadd.f32 %v3858_v35, %v4726_v12  ;;  %v2438_v37 = vpop.f32.mrb[67].mxu1 }
 0x379   : > { %v2439_v38 = vadd.f32 %v4726_v12, %v2438_v37 }
 0x37a   : > { %3989 = vtanh.f32 %v2444_v36 }
 0x37b   : > { %3991 = vtanh.f32 %v2439_v38  ;;  %v3861_v39 = vpop.f32.mrb[68].mxu1 }
 0x37c   : > { %v2454_v40 = vadd.f32 %v3861_v39, %v4726_v12  ;;  %v2448_v41 = vpop.f32.mrb[69].mxu1 }
 0x37d   : > { %v2449_v42 = vadd.f32 %v4726_v12, %v2448_v41 }
 0x37e   : > { %3993 = vtanh.f32 %v2454_v40 }
 0x37f   : > { %3995 = vtanh.f32 %v2449_v42  ;;  %v3864_v43 = vpop.f32.mrb[70].mxu1 }
 0x380   : > { %v3986_v44 = vpop.eup %3985  ;;  %v2464_v45 = vadd.f32 %v3864_v43, %v4726_v12  ;;  %v2458_v46 = vpop.f32.mrb[71].mxu1 }
 0x381   : > { %v3988_v47 = vpop.eup %3987  ;;  %v2812_v48 = vmul.f32 2.0, %v3986_v44  ;;  %v2459_v49 = vadd.f32 %v4726_v12, %v2458_v46 }
 0x382   : > { %v2811_v50 = vmul.f32 2.0, %v3988_v47  ;;  %3997 = vtanh.f32 %v2464_v45 }
 0x383   : > { %2877 = vst.msk [vmem:[%s4739_s29 + $0x8] sm:$0xff] %vm2875_vm2, %v2812_v48  ;;  %3999 = vtanh.f32 %v2459_v49  ;;  %v3867_v51 = vpop.f32.mrb[72].mxu1 }
 0x384   : > { %v3990_v52 = vpop.eup %3989  ;;  %2876 = vst.msk [vmem:[%s4739_s29] sm:$0xff] %vm2875_vm2, %v2811_v50  ;;  %v2474_v53 = vadd.f32 %v3867_v51, %v4726_v12  ;;  %v2468_v54 = vpop.f32.mrb[73].mxu1 }
 0x385   : > { %v3992_v55 = vpop.eup %3991  ;;  %v2814_v56 = vmul.f32 2.0, %v3990_v52  ;;  %v2469_v57 = vadd.f32 %v4726_v12, %v2468_v54 }
 0x386   : > { %v2813_v58 = vmul.f32 2.0, %v3992_v55  ;;  %4001 = vtanh.f32 %v2474_v53 }
 0x387   : > { %2879 = vst.msk [vmem:[%s4739_s29 + $0x18] sm:$0xff] %vm2875_vm2, %v2814_v56  ;;  %4003 = vtanh.f32 %v2469_v57  ;;  %v3870_v59 = vpop.f32.mrb[74].mxu1 }
 0x388   : > { %v3994_v60 = vpop.eup %3993  ;;  %2878 = vst.msk [vmem:[%s4739_s29 + $0x10] sm:$0xff] %vm2875_vm2, %v2813_v58  ;;  %v2484_v61 = vadd.f32 %v3870_v59, %v4726_v12  ;;  %v2478_v62 = vpop.f32.mrb[75].mxu1 }
 0x389   : > { %v3996_v63 = vpop.eup %3995  ;;  %v2816_v0 = vmul.f32 2.0, %v3994_v60  ;;  %v2479_v1 = vadd.f32 %v4726_v12, %v2478_v62 }
 0x38a   : > { %v2815_v2 = vmul.f32 2.0, %v3996_v63  ;;  %4005 = vtanh.f32 %v2484_v61 }
 0x38b   : > { %2881 = vst.msk [vmem:[%s4739_s29 + $0x28] sm:$0xff] %vm2875_vm2, %v2816_v0  ;;  %4007 = vtanh.f32 %v2479_v1  ;;  %v3873_v3 = vpop.f32.mrb[76].mxu1 }
 0x38c   : > { %v3998_v4 = vpop.eup %3997  ;;  %2880 = vst.msk [vmem:[%s4739_s29 + $0x20] sm:$0xff] %vm2875_vm2, %v2815_v2  ;;  %v2494_v5 = vadd.f32 %v3873_v3, %v4726_v12  ;;  %v2488_v6 = vpop.f32.mrb[77].mxu1 }
 0x38d   : > { %v4000_v7 = vpop.eup %3999  ;;  %v2818_v8 = vmul.f32 2.0, %v3998_v4  ;;  %v2489_v9 = vadd.f32 %v4726_v12, %v2488_v6 }
 0x38e   : > { %v2817_v10 = vmul.f32 2.0, %v4000_v7  ;;  %4009 = vtanh.f32 %v2494_v5 }
 0x38f   : > { %2883 = vst.msk [vmem:[%s4739_s29 + $0x38] sm:$0xff] %vm2875_vm2, %v2818_v8  ;;  %4011 = vtanh.f32 %v2489_v9  ;;  %v3876_v11 = vpop.f32.mrb[78].mxu1 }
 0x390   : > { %v4002_v13 = vpop.eup %4001  ;;  %2882 = vst.msk [vmem:[%s4739_s29 + $0x30] sm:$0xff] %vm2875_vm2, %v2817_v10  ;;  %v2504_v14 = vadd.f32 %v3876_v11, %v4726_v12  ;;  %v2498_v15 = vpop.f32.mrb[79].mxu1 }
 0x391   : > { %v4004_v16 = vpop.eup %4003  ;;  %v2820_v17 = vmul.f32 2.0, %v4002_v13  ;;  %v2499_v18 = vadd.f32 %v4726_v12, %v2498_v15 }
 0x392   : > { %v2819_v19 = vmul.f32 2.0, %v4004_v16  ;;  %4013 = vtanh.f32 %v2504_v14 }
 0x393   : > { %2885 = vst.msk [vmem:[%s4739_s29 + $0x48] sm:$0xff] %vm2875_vm2, %v2820_v17  ;;  %4015 = vtanh.f32 %v2499_v18  ;;  %v3879_v20 = vpop.f32.mrb[80].mxu1 }
 0x394   : > { %v4006_v21 = vpop.eup %4005  ;;  %2884 = vst.msk [vmem:[%s4739_s29 + $0x40] sm:$0xff] %vm2875_vm2, %v2819_v19  ;;  %v2514_v22 = vadd.f32 %v3879_v20, %v4726_v12  ;;  %v2508_v23 = vpop.f32.mrb[81].mxu1 }
 0x395   : > { %v4008_v24 = vpop.eup %4007  ;;  %v2822_v25 = vmul.f32 2.0, %v4006_v21  ;;  %v2509_v26 = vadd.f32 %v4726_v12, %v2508_v23 }
 0x396   : > { %v2821_v27 = vmul.f32 2.0, %v4008_v24  ;;  %4017 = vtanh.f32 %v2514_v22 }
 0x397   : > { %2887 = vst.msk [vmem:[%s4739_s29 + $0x58] sm:$0xff] %vm2875_vm2, %v2822_v25  ;;  %4019 = vtanh.f32 %v2509_v26  ;;  %v3882_v29 = vpop.f32.mrb[82].mxu1 }
 0x398   : > { %v4010_v30 = vpop.eup %4009  ;;  %2886 = vst.msk [vmem:[%s4739_s29 + $0x50] sm:$0xff] %vm2875_vm2, %v2821_v27  ;;  %v2524_v31 = vadd.f32 %v3882_v29, %v4726_v12  ;;  %v2518_v32 = vpop.f32.mrb[83].mxu1 }
 0x399   : > { %v4012_v33 = vpop.eup %4011  ;;  %v2824_v34 = vmul.f32 2.0, %v4010_v30  ;;  %v2519_v28 = vadd.f32 %v4726_v12, %v2518_v32 }
 0x39a   : > { %v2823_v35 = vmul.f32 2.0, %v4012_v33  ;;  %4021 = vtanh.f32 %v2524_v31 }
 0x39b   : > { %2889 = vst.msk [vmem:[%s4739_s29 + $0x68] sm:$0xff] %vm2875_vm2, %v2824_v34  ;;  %4023 = vtanh.f32 %v2519_v28  ;;  %v3885_v36 = vpop.f32.mrb[84].mxu1 }
 0x39c   : > { %v4014_v37 = vpop.eup %4013  ;;  %2888 = vst.msk [vmem:[%s4739_s29 + $0x60] sm:$0xff] %vm2875_vm2, %v2823_v35  ;;  %v2534_v38 = vadd.f32 %v3885_v36, %v4726_v12  ;;  %v2528_v39 = vpop.f32.mrb[85].mxu1 }
 0x39d   : > { %v4016_v40 = vpop.eup %4015  ;;  %v2826_v41 = vmul.f32 2.0, %v4014_v37  ;;  %v2529_v42 = vadd.f32 %v4726_v12, %v2528_v39 }
 0x39e   : > { %v2825_v43 = vmul.f32 2.0, %v4016_v40  ;;  %4025 = vtanh.f32 %v2534_v38 }
 0x39f   : > { %2891 = vst.msk [vmem:[%s4739_s29 + $0x78] sm:$0xff] %vm2875_vm2, %v2826_v41  ;;  %4027 = vtanh.f32 %v2529_v42  ;;  %v3888_v44 = vpop.f32.mrb[86].mxu1 }
 0x3a0   : > { %v4018_v45 = vpop.eup %4017  ;;  %2890 = vst.msk [vmem:[%s4739_s29 + $0x70] sm:$0xff] %vm2875_vm2, %v2825_v43  ;;  %v2544_v46 = vadd.f32 %v3888_v44, %v4726_v12  ;;  %v2538_v47 = vpop.f32.mrb[87].mxu1 }
 0x3a1   : > { %v4020_v48 = vpop.eup %4019  ;;  %v2828_v49 = vmul.f32 2.0, %v4018_v45  ;;  %v2539_v50 = vadd.f32 %v4726_v12, %v2538_v47 }
 0x3a2   : > { %v2827_v51 = vmul.f32 2.0, %v4020_v48  ;;  %4029 = vtanh.f32 %v2544_v46 }
 0x3a3   : > { %2893 = vst.msk [vmem:[%s4739_s29 + $0x88] sm:$0xff] %vm2875_vm2, %v2828_v49  ;;  %4031 = vtanh.f32 %v2539_v50  ;;  %v3891_v52 = vpop.f32.mrb[88].mxu1 }
 0x3a4   : > { %v4022_v53 = vpop.eup %4021  ;;  %2892 = vst.msk [vmem:[%s4739_s29 + $0x80] sm:$0xff] %vm2875_vm2, %v2827_v51  ;;  %v2554_v54 = vadd.f32 %v3891_v52, %v4726_v12  ;;  %v2548_v55 = vpop.f32.mrb[89].mxu1 }
 0x3a5   : > { %v4024_v56 = vpop.eup %4023  ;;  %v2830_v57 = vmul.f32 2.0, %v4022_v53  ;;  %v2549_v58 = vadd.f32 %v4726_v12, %v2548_v55 }
 0x3a6   : > { %v2829_v59 = vmul.f32 2.0, %v4024_v56  ;;  %4033 = vtanh.f32 %v2554_v54 }
 0x3a7   : > { %2895 = vst.msk [vmem:[%s4739_s29 + $0x98] sm:$0xff] %vm2875_vm2, %v2830_v57  ;;  %4035 = vtanh.f32 %v2549_v58  ;;  %v3894_v60 = vpop.f32.mrb[90].mxu1 }
 0x3a8   : > { %v4026_v61 = vpop.eup %4025  ;;  %2894 = vst.msk [vmem:[%s4739_s29 + $0x90] sm:$0xff] %vm2875_vm2, %v2829_v59  ;;  %v2564_v62 = vadd.f32 %v3894_v60, %v4726_v12  ;;  %v2558_v63 = vpop.f32.mrb[91].mxu1 }
 0x3a9   : > { %v4028_v0 = vpop.eup %4027  ;;  %v2832_v1 = vmul.f32 2.0, %v4026_v61  ;;  %v2559_v2 = vadd.f32 %v4726_v12, %v2558_v63 }
 0x3aa   : > { %v2831_v3 = vmul.f32 2.0, %v4028_v0  ;;  %4037 = vtanh.f32 %v2564_v62 }
 0x3ab   : > { %2897 = vst.msk [vmem:[%s4739_s29 + $0xa8] sm:$0xff] %vm2875_vm2, %v2832_v1  ;;  %4039 = vtanh.f32 %v2559_v2  ;;  %v3897_v4 = vpop.f32.mrb[92].mxu1 }
 0x3ac   : > { %v4030_v5 = vpop.eup %4029  ;;  %2896 = vst.msk [vmem:[%s4739_s29 + $0xa0] sm:$0xff] %vm2875_vm2, %v2831_v3  ;;  %v2574_v6 = vadd.f32 %v3897_v4, %v4726_v12  ;;  %v2568_v7 = vpop.f32.mrb[93].mxu1 }
 0x3ad   : > { %v4032_v8 = vpop.eup %4031  ;;  %v2834_v9 = vmul.f32 2.0, %v4030_v5  ;;  %v2569_v10 = vadd.f32 %v4726_v12, %v2568_v7 }
 0x3ae   : > { %v2833_v11 = vmul.f32 2.0, %v4032_v8  ;;  %4041 = vtanh.f32 %v2574_v6 }
 0x3af   : > { %2899 = vst.msk [vmem:[%s4739_s29 + $0xb8] sm:$0xff] %vm2875_vm2, %v2834_v9  ;;  %4043 = vtanh.f32 %v2569_v10  ;;  %v3900_v13 = vpop.f32.mrb[94].mxu1 }
 0x3b0   : > { %v4034_v14 = vpop.eup %4033  ;;  %2898 = vst.msk [vmem:[%s4739_s29 + $0xb0] sm:$0xff] %vm2875_vm2, %v2833_v11  ;;  %v2584_v15 = vadd.f32 %v3900_v13, %v4726_v12  ;;  %v2578_v16 = vpop.f32.mrb[95].mxu1 }
 0x3b1   : > { %v4036_v17 = vpop.eup %4035  ;;  %v2836_v18 = vmul.f32 2.0, %v4034_v14  ;;  %v2579_v19 = vadd.f32 %v4726_v12, %v2578_v16 }
 0x3b2   : > { %v2835_v20 = vmul.f32 2.0, %v4036_v17  ;;  %4045 = vtanh.f32 %v2584_v15 }
 0x3b3   : > { %2901 = vst.msk [vmem:[%s4739_s29 + $0xc8] sm:$0xff] %vm2875_vm2, %v2836_v18  ;;  %4047 = vtanh.f32 %v2579_v19  ;;  %v3903_v21 = vpop.f32.mrb[96].mxu1 }
 0x3b4   : > { %v4038_v22 = vpop.eup %4037  ;;  %2900 = vst.msk [vmem:[%s4739_s29 + $0xc0] sm:$0xff] %vm2875_vm2, %v2835_v20  ;;  %v2594_v23 = vadd.f32 %v3903_v21, %v4726_v12  ;;  %v2588_v24 = vpop.f32.mrb[97].mxu1 }
 0x3b5   : > { %v4040_v25 = vpop.eup %4039  ;;  %v2838_v26 = vmul.f32 2.0, %v4038_v22  ;;  %v2589_v27 = vadd.f32 %v4726_v12, %v2588_v24 }
 0x3b6   : > { %v2837_v29 = vmul.f32 2.0, %v4040_v25  ;;  %4049 = vtanh.f32 %v2594_v23 }
 0x3b7   : > { %2903 = vst.msk [vmem:[%s4739_s29 + $0xd8] sm:$0xff] %vm2875_vm2, %v2838_v26  ;;  %4051 = vtanh.f32 %v2589_v27  ;;  %v3906_v30 = vpop.f32.mrb[98].mxu1 }
 0x3b8   : > { %v4042_v31 = vpop.eup %4041  ;;  %2902 = vst.msk [vmem:[%s4739_s29 + $0xd0] sm:$0xff] %vm2875_vm2, %v2837_v29  ;;  %v2604_v32 = vadd.f32 %v3906_v30, %v4726_v12  ;;  %v2598_v33 = vpop.f32.mrb[99].mxu1 }
 0x3b9   : > { %v4044_v34 = vpop.eup %4043  ;;  %v2840_v28 = vmul.f32 2.0, %v4042_v31  ;;  %v2599_v35 = vadd.f32 %v4726_v12, %v2598_v33 }
 0x3ba   : > { %v2839_v36 = vmul.f32 2.0, %v4044_v34  ;;  %4053 = vtanh.f32 %v2604_v32 }
 0x3bb   : > { %2905 = vst.msk [vmem:[%s4739_s29 + $0xe8] sm:$0xff] %vm2875_vm2, %v2840_v28  ;;  %4055 = vtanh.f32 %v2599_v35  ;;  %v3909_v37 = vpop.f32.mrb[100].mxu1 }
 0x3bc   : > { %v4046_v38 = vpop.eup %4045  ;;  %2904 = vst.msk [vmem:[%s4739_s29 + $0xe0] sm:$0xff] %vm2875_vm2, %v2839_v36  ;;  %v2614_v39 = vadd.f32 %v3909_v37, %v4726_v12  ;;  %v2608_v40 = vpop.f32.mrb[101].mxu1 }
 0x3bd   : > { %v4048_v41 = vpop.eup %4047  ;;  %v2842_v42 = vmul.f32 2.0, %v4046_v38  ;;  %v2609_v43 = vadd.f32 %v4726_v12, %v2608_v40 }
 0x3be   : > { %v2841_v44 = vmul.f32 2.0, %v4048_v41  ;;  %4057 = vtanh.f32 %v2614_v39 }
 0x3bf   : > { %2907 = vst.msk [vmem:[%s4739_s29 + $0xf8] sm:$0xff] %vm2875_vm2, %v2842_v42  ;;  %4059 = vtanh.f32 %v2609_v43  ;;  %v3912_v45 = vpop.f32.mrb[102].mxu1 }
 0x3c0   : > { %v4050_v46 = vpop.eup %4049  ;;  %2906 = vst.msk [vmem:[%s4739_s29 + $0xf0] sm:$0xff] %vm2875_vm2, %v2841_v44  ;;  %v2624_v47 = vadd.f32 %v3912_v45, %v4726_v12  ;;  %v2618_v48 = vpop.f32.mrb[103].mxu1 }
 0x3c1   : > { %v4052_v49 = vpop.eup %4051  ;;  %v2844_v50 = vmul.f32 2.0, %v4050_v46  ;;  %v2619_v51 = vadd.f32 %v4726_v12, %v2618_v48 }
 0x3c2   : > { %v2843_v52 = vmul.f32 2.0, %v4052_v49  ;;  %4061 = vtanh.f32 %v2624_v47 }
 0x3c3   : > { %2909 = vst.msk [vmem:[%s4739_s29 + $0x108] sm:$0xff] %vm2875_vm2, %v2844_v50  ;;  %4063 = vtanh.f32 %v2619_v51  ;;  %v3915_v53 = vpop.f32.mrb[104].mxu1 }
 0x3c4   : > { %v4054_v54 = vpop.eup %4053  ;;  %2908 = vst.msk [vmem:[%s4739_s29 + $0x100] sm:$0xff] %vm2875_vm2, %v2843_v52  ;;  %v2634_v55 = vadd.f32 %v3915_v53, %v4726_v12  ;;  %v2628_v56 = vpop.f32.mrb[105].mxu1 }
 0x3c5   : > { %v4056_v57 = vpop.eup %4055  ;;  %v2846_v58 = vmul.f32 2.0, %v4054_v54  ;;  %v2629_v59 = vadd.f32 %v4726_v12, %v2628_v56 }
 0x3c6   : > { %v2845_v60 = vmul.f32 2.0, %v4056_v57  ;;  %4065 = vtanh.f32 %v2634_v55 }
 0x3c7   : > { %2911 = vst.msk [vmem:[%s4739_s29 + $0x118] sm:$0xff] %vm2875_vm2, %v2846_v58  ;;  %4067 = vtanh.f32 %v2629_v59  ;;  %v3918_v61 = vpop.f32.mrb[106].mxu1 }
 0x3c8   : > { %v4058_v62 = vpop.eup %4057  ;;  %2910 = vst.msk [vmem:[%s4739_s29 + $0x110] sm:$0xff] %vm2875_vm2, %v2845_v60  ;;  %v2644_v63 = vadd.f32 %v3918_v61, %v4726_v12  ;;  %v2638_v0 = vpop.f32.mrb[107].mxu1 }
 0x3c9   : > { %v4060_v1 = vpop.eup %4059  ;;  %v2848_v2 = vmul.f32 2.0, %v4058_v62  ;;  %v2639_v3 = vadd.f32 %v4726_v12, %v2638_v0 }
 0x3ca   : > { %v2847_v4 = vmul.f32 2.0, %v4060_v1  ;;  %4069 = vtanh.f32 %v2644_v63 }
 0x3cb   : > { %2913 = vst.msk [vmem:[%s4739_s29 + $0x128] sm:$0xff] %vm2875_vm2, %v2848_v2  ;;  %4071 = vtanh.f32 %v2639_v3  ;;  %v3921_v5 = vpop.f32.mrb[108].mxu1 }
 0x3cc   : > { %v4062_v6 = vpop.eup %4061  ;;  %2912 = vst.msk [vmem:[%s4739_s29 + $0x120] sm:$0xff] %vm2875_vm2, %v2847_v4  ;;  %v2654_v7 = vadd.f32 %v3921_v5, %v4726_v12  ;;  %v2648_v8 = vpop.f32.mrb[109].mxu1 }
 0x3cd   : > { %v4064_v9 = vpop.eup %4063  ;;  %v2850_v10 = vmul.f32 2.0, %v4062_v6  ;;  %v2649_v11 = vadd.f32 %v4726_v12, %v2648_v8 }
 0x3ce   : > { %v2849_v13 = vmul.f32 2.0, %v4064_v9  ;;  %4073 = vtanh.f32 %v2654_v7 }
 0x3cf   : > { %2915 = vst.msk [vmem:[%s4739_s29 + $0x138] sm:$0xff] %vm2875_vm2, %v2850_v10  ;;  %4075 = vtanh.f32 %v2649_v11  ;;  %v3924_v14 = vpop.f32.mrb[110].mxu1 }
 0x3d0   : > { %v4066_v15 = vpop.eup %4065  ;;  %2914 = vst.msk [vmem:[%s4739_s29 + $0x130] sm:$0xff] %vm2875_vm2, %v2849_v13  ;;  %v2664_v16 = vadd.f32 %v3924_v14, %v4726_v12  ;;  %v2658_v17 = vpop.f32.mrb[111].mxu1 }
 0x3d1   : > { %v4068_v18 = vpop.eup %4067  ;;  %v2852_v19 = vmul.f32 2.0, %v4066_v15  ;;  %v2659_v20 = vadd.f32 %v4726_v12, %v2658_v17 }
 0x3d2   : > { %v2851_v21 = vmul.f32 2.0, %v4068_v18  ;;  %4077 = vtanh.f32 %v2664_v16 }
 0x3d3   : > { %2917 = vst.msk [vmem:[%s4739_s29 + $0x148] sm:$0xff] %vm2875_vm2, %v2852_v19  ;;  %4079 = vtanh.f32 %v2659_v20  ;;  %v3927_v22 = vpop.f32.mrb[112].mxu1 }
 0x3d4   : > { %v4070_v23 = vpop.eup %4069  ;;  %2916 = vst.msk [vmem:[%s4739_s29 + $0x140] sm:$0xff] %vm2875_vm2, %v2851_v21  ;;  %v2674_v24 = vadd.f32 %v3927_v22, %v4726_v12  ;;  %v2668_v25 = vpop.f32.mrb[113].mxu1 }
 0x3d5   : > { %v4072_v26 = vpop.eup %4071  ;;  %v2854_v27 = vmul.f32 2.0, %v4070_v23  ;;  %v2669_v29 = vadd.f32 %v4726_v12, %v2668_v25 }
 0x3d6   : > { %v2853_v30 = vmul.f32 2.0, %v4072_v26  ;;  %4081 = vtanh.f32 %v2674_v24 }
 0x3d7   : > { %2919 = vst.msk [vmem:[%s4739_s29 + $0x158] sm:$0xff] %vm2875_vm2, %v2854_v27  ;;  %4083 = vtanh.f32 %v2669_v29  ;;  %v3930_v31 = vpop.f32.mrb[114].mxu1 }
 0x3d8   : > { %v4074_v32 = vpop.eup %4073  ;;  %2918 = vst.msk [vmem:[%s4739_s29 + $0x150] sm:$0xff] %vm2875_vm2, %v2853_v30  ;;  %v2684_v33 = vadd.f32 %v3930_v31, %v4726_v12  ;;  %v2678_v34 = vpop.f32.mrb[115].mxu1 }
 0x3d9   : > { %v4076_v28 = vpop.eup %4075  ;;  %v2856_v35 = vmul.f32 2.0, %v4074_v32  ;;  %v2679_v36 = vadd.f32 %v4726_v12, %v2678_v34 }
 0x3da   : > { %v2855_v37 = vmul.f32 2.0, %v4076_v28  ;;  %4085 = vtanh.f32 %v2684_v33 }
 0x3db   : > { %2921 = vst.msk [vmem:[%s4739_s29 + $0x168] sm:$0xff] %vm2875_vm2, %v2856_v35  ;;  %4087 = vtanh.f32 %v2679_v36  ;;  %v3933_v38 = vpop.f32.mrb[116].mxu1 }
 0x3dc   : > { %v4078_v39 = vpop.eup %4077  ;;  %2920 = vst.msk [vmem:[%s4739_s29 + $0x160] sm:$0xff] %vm2875_vm2, %v2855_v37  ;;  %v2694_v40 = vadd.f32 %v3933_v38, %v4726_v12  ;;  %v2688_v41 = vpop.f32.mrb[117].mxu1 }
 0x3dd   : > { %v4080_v42 = vpop.eup %4079  ;;  %v2858_v43 = vmul.f32 2.0, %v4078_v39  ;;  %v2689_v44 = vadd.f32 %v4726_v12, %v2688_v41 }
 0x3de   : > { %v2857_v45 = vmul.f32 2.0, %v4080_v42  ;;  %4089 = vtanh.f32 %v2694_v40 }
 0x3df   : > { %2923 = vst.msk [vmem:[%s4739_s29 + $0x178] sm:$0xff] %vm2875_vm2, %v2858_v43  ;;  %4091 = vtanh.f32 %v2689_v44  ;;  %v3936_v46 = vpop.f32.mrb[118].mxu1 }
 0x3e0   : > { %v4082_v47 = vpop.eup %4081  ;;  %2922 = vst.msk [vmem:[%s4739_s29 + $0x170] sm:$0xff] %vm2875_vm2, %v2857_v45  ;;  %v2704_v48 = vadd.f32 %v3936_v46, %v4726_v12  ;;  %v2698_v49 = vpop.f32.mrb[119].mxu1 }
 0x3e1   : > { %v4084_v50 = vpop.eup %4083  ;;  %v2860_v51 = vmul.f32 2.0, %v4082_v47  ;;  %v2699_v52 = vadd.f32 %v4726_v12, %v2698_v49 }
 0x3e2   : > { %v2859_v53 = vmul.f32 2.0, %v4084_v50  ;;  %4093 = vtanh.f32 %v2704_v48 }
 0x3e3   : > { %2925 = vst.msk [vmem:[%s4739_s29 + $0x188] sm:$0xff] %vm2875_vm2, %v2860_v51  ;;  %4095 = vtanh.f32 %v2699_v52  ;;  %v3939_v54 = vpop.f32.mrb[120].mxu1 }
 0x3e4   : > { %v4086_v55 = vpop.eup %4085  ;;  %2924 = vst.msk [vmem:[%s4739_s29 + $0x180] sm:$0xff] %vm2875_vm2, %v2859_v53  ;;  %v2714_v56 = vadd.f32 %v3939_v54, %v4726_v12  ;;  %v2708_v57 = vpop.f32.mrb[121].mxu1 }
 0x3e5   : > { %v4088_v58 = vpop.eup %4087  ;;  %v2862_v59 = vmul.f32 2.0, %v4086_v55  ;;  %v2709_v60 = vadd.f32 %v4726_v12, %v2708_v57 }
 0x3e6   : > { %v2861_v61 = vmul.f32 2.0, %v4088_v58  ;;  %4097 = vtanh.f32 %v2714_v56 }
 0x3e7   : > { %2927 = vst.msk [vmem:[%s4739_s29 + $0x198] sm:$0xff] %vm2875_vm2, %v2862_v59  ;;  %4099 = vtanh.f32 %v2709_v60  ;;  %v3942_v62 = vpop.f32.mrb[122].mxu1 }
 0x3e8   : > { %v4090_v63 = vpop.eup %4089  ;;  %2926 = vst.msk [vmem:[%s4739_s29 + $0x190] sm:$0xff] %vm2875_vm2, %v2861_v61  ;;  %v2724_v0 = vadd.f32 %v3942_v62, %v4726_v12  ;;  %v2718_v1 = vpop.f32.mrb[123].mxu1 }
 0x3e9   : > { %v4092_v2 = vpop.eup %4091  ;;  %v2864_v3 = vmul.f32 2.0, %v4090_v63  ;;  %v2719_v4 = vadd.f32 %v4726_v12, %v2718_v1 }
 0x3ea   : > { %v2863_v5 = vmul.f32 2.0, %v4092_v2  ;;  %4101 = vtanh.f32 %v2724_v0 }
 0x3eb   : > { %2929 = vst.msk [vmem:[%s4739_s29 + $0x1a8] sm:$0xff] %vm2875_vm2, %v2864_v3  ;;  %4103 = vtanh.f32 %v2719_v4  ;;  %v3945_v6 = vpop.f32.mrb[124].mxu1 }
 0x3ec   : > { %v4094_v7 = vpop.eup %4093  ;;  %2928 = vst.msk [vmem:[%s4739_s29 + $0x1a0] sm:$0xff] %vm2875_vm2, %v2863_v5  ;;  %v2734_v8 = vadd.f32 %v3945_v6, %v4726_v12  ;;  %v2728_v9 = vpop.f32.mrb[125].mxu1 }
 0x3ed   : > { %v4096_v10 = vpop.eup %4095  ;;  %v2866_v11 = vmul.f32 2.0, %v4094_v7  ;;  %v2729_v13 = vadd.f32 %v4726_v12, %v2728_v9 }
 0x3ee   : > { %v2865_v14 = vmul.f32 2.0, %v4096_v10  ;;  %4105 = vtanh.f32 %v2734_v8 }
 0x3ef   : > { %2931 = vst.msk [vmem:[%s4739_s29 + $0x1b8] sm:$0xff] %vm2875_vm2, %v2866_v11  ;;  %4107 = vtanh.f32 %v2729_v13  ;;  %v3948_v15 = vpop.f32.mrb[126].mxu1 }
 0x3f0   : > { %v4098_v16 = vpop.eup %4097  ;;  %2930 = vst.msk [vmem:[%s4739_s29 + $0x1b0] sm:$0xff] %vm2875_vm2, %v2865_v14  ;;  %v2744_v17 = vadd.f32 %v3948_v15, %v4726_v12  ;;  %v2738_v18 = vpop.f32.mrb[127].mxu1 }
 0x3f1   : > { %v4100_v19 = vpop.eup %4099  ;;  %v2868_v20 = vmul.f32 2.0, %v4098_v16  ;;  %v2739_v21 = vadd.f32 %v4726_v12, %v2738_v18 }
 0x3f2   : > { %v2867_v22 = vmul.f32 2.0, %v4100_v19  ;;  %4109 = vtanh.f32 %v2744_v17 }
 0x3f3   : > { %2933 = vst.msk [vmem:[%s4739_s29 + $0x1c8] sm:$0xff] %vm2875_vm2, %v2868_v20  ;;  %4111 = vtanh.f32 %v2739_v21 }
 0x3f4   : > { %v4102_v23 = vpop.eup %4101  ;;  %2932 = vst.msk [vmem:[%s4739_s29 + $0x1c0] sm:$0xff] %vm2875_vm2, %v2867_v22 }
 0x3f5   : > { %v4104_v24 = vpop.eup %4103  ;;  %v2870_v25 = vmul.f32 2.0, %v4102_v23 }
 0x3f6   : > { %v2869_v26 = vmul.f32 2.0, %v4104_v24 }
 0x3f7   : > { %2935 = vst.msk [vmem:[%s4739_s29 + $0x1d8] sm:$0xff] %vm2875_vm2, %v2870_v25 }
 0x3f8   : > { %v4106_v27 = vpop.eup %4105  ;;  %2934 = vst.msk [vmem:[%s4739_s29 + $0x1d0] sm:$0xff] %vm2875_vm2, %v2869_v26 }
 0x3f9   : > { %v4108_v12 = vpop.eup %4107  ;;  %v2872_v29 = vmul.f32 2.0, %v4106_v27 }
 0x3fa   : > { %v2871_v30 = vmul.f32 2.0, %v4108_v12 }
 0x3fb   : > { %2937 = vst.msk [vmem:[%s4739_s29 + $0x1e8] sm:$0xff] %vm2875_vm2, %v2872_v29 }
 0x3fc   : > { %v4110_v31 = vpop.eup %4109  ;;  %2936 = vst.msk [vmem:[%s4739_s29 + $0x1e0] sm:$0xff] %vm2875_vm2, %v2871_v30 }
 0x3fd   : > { %v4112_v32 = vpop.eup %4111  ;;  %v2874_v33 = vmul.f32 2.0, %v4110_v31 }
 0x3fe   : > { %v2873_v34 = vmul.f32 2.0, %v4112_v32 }
 0x3ff   : > { %2939 = vst.msk [vmem:[%s4739_s29 + $0x1f8] sm:$0xff] %vm2875_vm2, %v2874_v33 }
 0x400   : > { %2938 = vst.msk [vmem:[%s4739_s29 + $0x1f0] sm:$0xff] %vm2875_vm2, %v2873_v34 }
 0x401 PF: > { %s12_s9 = sadd.s32 1, %s4119_s9  }
 0x402   : > { %p9_p4 = scmp.ge.s32.totalorder %s12_s9, 4  }
 0x404   :  { %11 = sbr.rel (!%p9_p4) target bundleno = 1 (0x1), region = 58 }

</bundles_post_ra>
